<compile_context>
chip_gen: v6e
topology: v6e:2x2x1
jax: 0.10.0
libtpu: 0.0.40
codegen_flags: <defaults>
</compile_context>

<pallas_src>
import functools

import jax
import jax.numpy as jnp
from jax.experimental import pallas as pl
from jax.experimental.pallas import tpu as pltpu

_MXU_DTYPE = jnp.float32


def _residual_kernel(*refs, H, W, eps, use_1x1conv):
    if use_1x1conv:
        (x_ref, w1b_ref, g1_ref, bt1_ref,
         w2b_ref, g2_ref, bt2_ref, p_ref,
         w3b_ref, b3_ref, out_ref) = refs
    else:
        (x_ref, w1b_ref, g1_ref, bt1_ref,
         w2b_ref, g2_ref, bt2_ref, p_ref, out_ref) = refs
        w3b_ref = b3_ref = None

    N, _, L = out_ref.shape              # L == W * c_out (lane-dense, 128 here)
    Hp = H + 2                           # per-sample row stride incl. vertical pad
    inv_cnt = 1.0 / float(N * H * W)

    def conv_all(src, wband_ref):
        """3x3 conv (stride 1) of ALL samples via 3 band matmuls.

        `src` is (N*Hp, K) with zero rows at each sample's vertical-pad
        positions.  Returns per-sample (H, L) outputs plus the f32 BN sum and
        sum-of-squares over all valid output rows (single pass).
        """
        lhs = src.astype(_MXU_DTYPE)
        yd = [jnp.dot(lhs, wband_ref[dy], preferred_element_type=jnp.float32)
              for dy in range(3)]
        outs = []
        s = jnp.zeros((1, L), jnp.float32)
        ss = jnp.zeros((1, L), jnp.float32)
        for n in range(N):
            r = n * Hp
            yn = yd[0][r:r + H] + yd[1][r + 1:r + H + 1] + yd[2][r + 2:r + H + 2]
            outs.append(yn)
            s = s + jnp.sum(yn, axis=0, keepdims=True)
            ss = ss + jnp.sum(yn * yn, axis=0, keepdims=True)
        return outs, s, ss

    def bn_scale_shift(s, ss, g_ref, bt_ref):
        # Training-mode BN (biased variance; single-pass E[x^2]-E[x]^2 in f32 --
        # slightly less stable than two-pass but fine at this scale) folded into
        # one per-lane scale/shift.  A single (2,L)@(L,L) matmul with the 0/1
        # "same channel" matrix both reduces over the W lane-groups of each
        # channel and broadcasts the result back to every lane.
        red = jnp.dot(jnp.concatenate([s, ss], axis=0), p_ref[...],
                      preferred_element_type=jnp.float32) * inv_cnt
        mean, ex2 = red[0:1], red[1:2]
        inv = jax.lax.rsqrt(ex2 - mean * mean + eps)
        scale = g_ref[...] * inv
        return scale, bt_ref[...] - scale * mean

    # ---- conv1 + BN1 stats (conv biases cancel under training-mode BN) -------
    x = x_ref[...]                       # (N*Hp, W*c_in), vertical pad rows only
    y1, s1, ss1 = conv_all(x, w1b_ref)
    scale1, shift1 = bn_scale_shift(s1, ss1, g1_ref, bt1_ref)

    # ---- bn1 + relu; rebuild the vertically padded conv2 operand in-register --
    zrow = jnp.zeros((1, L), jnp.float32)
    pieces = []
    for n in range(N):
        pieces += [zrow, jnp.maximum(y1[n] * scale1 + shift1, 0.0), zrow]
    x2 = jnp.concatenate(pieces, axis=0)    # (N*Hp, L); no VMEM round-trip

    # ---- conv2 + BN2 stats ----------------------------------------------------
    y2, s2, ss2 = conv_all(x2, w2b_ref)
    scale2, shift2 = bn_scale_shift(s2, ss2, g2_ref, bt2_ref)

    # ---- shortcut (batched over all samples) + add + relu ---------------------
    if use_1x1conv:
        short = jnp.dot(x.astype(_MXU_DTYPE), w3b_ref[...],
                        preferred_element_type=jnp.float32) + b3_ref[...]
    else:
        short = x                         # identity: requires c_in == c_out
    for n in range(N):
        r = n * Hp
        out_ref[n] = jnp.maximum(
            y2[n] * scale2 + shift2 + short[r + 1:r + H + 1], 0.0
        ).astype(out_ref.dtype)


def _band_matrices(w_hwio, W):
    """(3,3,Cin,Cout) HWIO conv weights -> (3, W*Cin, W*Cout) band matrices.

    Band dy has w[dy, dx, ci, co] at row (w+dx-1)*Cin+ci, column w*Cout+co
    (row indices outside [0, W) fall off the matrix, giving the implicit
    horizontal zero padding), so with vertically padded lane-dense rows
      out[h, w*Cout+co] = sum_dy  x_rows[h+dy, :] @ band[dy]
    is exactly the padded 3x3 convolution.  No lane padding -> K = W*Cin.
    """
    _, _, cin, cout = w_hwio.shape
    bands = []
    for dy in range(3):
        m = jnp.zeros((W * cin, W * cout), w_hwio.dtype)
        for dx in range(3):
            m = m + jnp.kron(jnp.eye(W, W, k=1 - dx, dtype=w_hwio.dtype),
                             w_hwio[dy, dx])
        bands.append(m)
    return jnp.stack(bands)


def residual_forward(x_nchw, params, *, use_1x1conv, stride=1):
    if stride != 1:
        # TODO(synk): stride > 1 (strided conv1/conv3) not implemented in the kernel.
        raise NotImplementedError("stride > 1 not supported")
    x = jnp.transpose(x_nchw, (0, 2, 3, 1))                    # NCHW -> NHWC
    N, H, W, c_in = x.shape
    c_out = params["w1"].shape[-1]
    if not use_1x1conv and c_in != c_out:
        raise ValueError("identity shortcut requires input_channels == num_channels")
    L = W * c_out
    Hp = H + 2

    # Wrapper glue (pure XLA, outside the kernel): vertical-only zero pad, fold
    # (W, C) onto the 128-lane minor axis, stack the batch along rows, build
    # band / channel-projection matrices, tile per-channel BN parameters to
    # per-lane vectors.  Conv biases b1/b2 are NOT passed in (exact BN cancel).
    xs = jnp.pad(x, ((0, 0), (1, 1), (0, 0), (0, 0))).reshape(N * Hp, W * c_in)
    w1b = _band_matrices(params["w1"], W).astype(_MXU_DTYPE)
    w2b = _band_matrices(params["w2"], W).astype(_MXU_DTYPE)
    proj = jnp.tile(jnp.eye(c_out, dtype=jnp.float32), (W, W))  # 1 iff same channel
    tile = lambda v: jnp.tile(v.reshape(1, c_out), (1, W))      # (1,C) -> (1,W*C)

    inputs = [xs, w1b, tile(params["g1"]), tile(params["bt1"]),
              w2b, tile(params["g2"]), tile(params["bt2"]), proj]
    if use_1x1conv:
        inputs += [jnp.kron(jnp.eye(W, dtype=jnp.float32),
                            params["w3"]).astype(_MXU_DTYPE),
                   tile(params["b3"])]

    kernel = functools.partial(_residual_kernel, H=H, W=W, eps=1e-5,
                               use_1x1conv=use_1x1conv)
    # TODO(synk): training-mode BN needs whole-batch statistics; for production
    # N/H/W this should become a two-pass kernel so batch/row tiles can go on a
    # "parallel" grid axis (and the second v7x TensorCore).  At this size the
    # whole problem fits in one VMEM block and is launch-latency bound.
    out = pl.pallas_call(
        kernel,
        out_shape=jax.ShapeDtypeStruct((N, H, L), x.dtype),
        grid=(1,),
        in_specs=[pl.BlockSpec(a.shape, lambda i, nd=a.ndim: (0,) * nd)
                  for a in inputs],
        out_specs=pl.BlockSpec((N, H, L), lambda i: (0, 0, 0)),
        compiler_params=pltpu.CompilerParams(
            dimension_semantics=("arbitrary",)),
    )(*inputs)
    out = out.reshape(N, H, W, c_out)                          # un-fold lanes
    return jnp.transpose(out, (0, 3, 1, 2))                    # NHWC -> NCHW


def init_params(key, c_in, c_out, use_1x1conv):
    ks = jax.random.split(key, 6)
    s1 = 1.0 / (c_in * 9) ** 0.5
    s2 = 1.0 / (c_out * 9) ** 0.5
    p = {
        "w1": jax.random.uniform(ks[0], (3, 3, c_in, c_out), jnp.float32, -s1, s1),
        "b1": jax.random.uniform(ks[1], (1, c_out), jnp.float32, -s1, s1),
        "w2": jax.random.uniform(ks[2], (3, 3, c_out, c_out), jnp.float32, -s2, s2),
        "b2": jax.random.uniform(ks[3], (1, c_out), jnp.float32, -s2, s2),
        "g1": jnp.ones((1, c_out), jnp.float32),
        "bt1": jnp.zeros((1, c_out), jnp.float32),
        "g2": jnp.ones((1, c_out), jnp.float32),
        "bt2": jnp.zeros((1, c_out), jnp.float32),
    }
    if use_1x1conv:
        s3 = 1.0 / c_in ** 0.5
        p["w3"] = jax.random.uniform(ks[4], (c_in, c_out), jnp.float32, -s3, s3)
        p["b3"] = jax.random.uniform(ks[5], (1, c_out), jnp.float32, -s3, s3)
    return p


def residual_ref(x_nchw, params, *, use_1x1conv, eps=1e-5):
    """Pure-JAX reference (same math as the PyTorch module in training mode)."""
    def conv(x, w_hwio, b, pad):
        y = jax.lax.conv_general_dilated(
            x, w_hwio, window_strides=(1, 1),
            padding=((pad, pad), (pad, pad)),
            dimension_numbers=("NCHW", "HWIO", "NCHW"))
        return y + b.reshape(1, -1, 1, 1)

    def bn(y, g, bt):
        mean = jnp.mean(y, axis=(0, 2, 3), keepdims=True)
        var = jnp.mean((y - mean) ** 2, axis=(0, 2, 3), keepdims=True)
        return (g.reshape(1, -1, 1, 1) * (y - mean) * jax.lax.rsqrt(var + eps)
                + bt.reshape(1, -1, 1, 1))

    y = jax.nn.relu(bn(conv(x_nchw, params["w1"], params["b1"], 1),
                       params["g1"], params["bt1"]))
    y = bn(conv(y, params["w2"], params["b2"], 1), params["g2"], params["bt2"])
    if use_1x1conv:
        c_in, c_out = params["w3"].shape
        xs = conv(x_nchw, params["w3"].reshape(1, 1, c_in, c_out), params["b3"], 0)
    else:
        xs = x_nchw
    return jax.nn.relu(y + xs)


if __name__ == "__main__":
    key = jax.random.PRNGKey(0)
    kx, kp1, kp2 = jax.random.split(key, 3)

    # Case 1: channel expansion with 1x1-conv shortcut (4 -> 8 channels).
    x1 = jax.random.normal(kx, (2, 4, 16, 16), jnp.float32)   # NCHW, like PyTorch
    p1 = init_params(kp1, 4, 8, use_1x1conv=True)
    out1 = jax.block_until_ready(residual_forward(x1, p1, use_1x1conv=True))
    ref1 = residual_ref(x1, p1, use_1x1conv=True)
    assert out1.shape == (2, 8, 16, 16) and out1.dtype == jnp.float32
    assert jnp.allclose(out1, ref1, atol=2e-3, rtol=2e-3), \
        float(jnp.max(jnp.abs(out1 - ref1)))

    # Case 2: identity shortcut (input_channels == num_channels == 8).
    x2 = jax.random.normal(kx, (2, 8, 16, 16), jnp.float32)
    p2 = init_params(kp2, 8, 8, use_1x1conv=False)
    out2 = jax.block_until_ready(residual_forward(x2, p2, use_1x1conv=False))
    ref2 = residual_ref(x2, p2, use_1x1conv=False)
    assert out2.shape == (2, 8, 16, 16)
    assert jnp.allclose(out2, ref2, atol=2e-3, rtol=2e-3), \
        float(jnp.max(jnp.abs(out2 - ref2)))

    print("KERNEL_OK")
</pallas_src>

<mosaic_0001>
module attributes {stable_mosaic.version = 11 : i64} {
  func.func @_residual_kernel(%arg0: i32, %arg1: memref<36x64xf32, #tpu.memory_space<vmem>>, %arg2: memref<3x64x128xf32, #tpu.memory_space<vmem>>, %arg3: memref<1x128xf32, #tpu.memory_space<vmem>>, %arg4: memref<1x128xf32, #tpu.memory_space<vmem>>, %arg5: memref<3x128x128xf32, #tpu.memory_space<vmem>>, %arg6: memref<1x128xf32, #tpu.memory_space<vmem>>, %arg7: memref<1x128xf32, #tpu.memory_space<vmem>>, %arg8: memref<128x128xf32, #tpu.memory_space<vmem>>, %arg9: memref<64x128xf32, #tpu.memory_space<vmem>>, %arg10: memref<1x128xf32, #tpu.memory_space<vmem>>, %arg11: memref<2x16x128xf32, #tpu.memory_space<vmem>>) attributes {dimension_semantics = [#tpu.dimension_semantics<arbitrary>], iteration_bounds = array<i64: 1>, scalar_prefetch = 0 : i64, scratch_operands = 0 : i64, tpu.core_type = #tpu.core_type<tc>, window_params = [{pipeline_mode = #tpu.pipeline_mode<synchronous>, transform_indices = @transform_0, window_bounds = array<i64: 36, 64>}, {pipeline_mode = #tpu.pipeline_mode<synchronous>, transform_indices = @transform_1, window_bounds = array<i64: 3, 64, 128>}, {pipeline_mode = #tpu.pipeline_mode<synchronous>, transform_indices = @transform_2, window_bounds = array<i64: 1, 128>}, {pipeline_mode = #tpu.pipeline_mode<synchronous>, transform_indices = @transform_3, window_bounds = array<i64: 1, 128>}, {pipeline_mode = #tpu.pipeline_mode<synchronous>, transform_indices = @transform_4, window_bounds = array<i64: 3, 128, 128>}, {pipeline_mode = #tpu.pipeline_mode<synchronous>, transform_indices = @transform_5, window_bounds = array<i64: 1, 128>}, {pipeline_mode = #tpu.pipeline_mode<synchronous>, transform_indices = @transform_6, window_bounds = array<i64: 1, 128>}, {pipeline_mode = #tpu.pipeline_mode<synchronous>, transform_indices = @transform_7, window_bounds = array<i64: 128, 128>}, {pipeline_mode = #tpu.pipeline_mode<synchronous>, transform_indices = @transform_8, window_bounds = array<i64: 64, 128>}, {pipeline_mode = #tpu.pipeline_mode<synchronous>, transform_indices = @transform_9, window_bounds = array<i64: 1, 128>}, {pipeline_mode = #tpu.pipeline_mode<synchronous>, transform_indices = @transform_10, window_bounds = array<i64: 2, 16, 128>}]} {
    %c0 = arith.constant 0 : index
    %c0_0 = arith.constant 0 : index
    %0 = vector.load %arg1[%c0, %c0_0] : memref<36x64xf32, #tpu.memory_space<vmem>>, vector<36x64xf32>
    %c0_1 = arith.constant 0 : index
    %c0_2 = arith.constant 0 : index
    %c0_3 = arith.constant 0 : index
    %1 = vector.load %arg2[%c0_1, %c0_2, %c0_3] : memref<3x64x128xf32, #tpu.memory_space<vmem>>, vector<1x64x128xf32>
    %2 = vector.shape_cast %1 : vector<1x64x128xf32> to vector<64x128xf32>
    %cst = arith.constant dense<0.000000e+00> : vector<36x128xf32>
    %3 = tpu.matmul %0, %2, %cst {dimension_numbers = #tpu.dot_dimension_numbers<[1], [0], [0], [1], [0, 0, 1, 1], [], []>} : vector<36x64xf32>, vector<64x128xf32>, vector<36x128xf32> -> vector<36x128xf32>
    %c1 = arith.constant 1 : index
    %c0_4 = arith.constant 0 : index
    %c0_5 = arith.constant 0 : index
    %4 = vector.load %arg2[%c1, %c0_4, %c0_5] : memref<3x64x128xf32, #tpu.memory_space<vmem>>, vector<1x64x128xf32>
    %5 = vector.shape_cast %4 : vector<1x64x128xf32> to vector<64x128xf32>
    %cst_6 = arith.constant dense<0.000000e+00> : vector<36x128xf32>
    %6 = tpu.matmul %0, %5, %cst_6 {dimension_numbers = #tpu.dot_dimension_numbers<[1], [0], [0], [1], [0, 0, 1, 1], [], []>} : vector<36x64xf32>, vector<64x128xf32>, vector<36x128xf32> -> vector<36x128xf32>
    %c2 = arith.constant 2 : index
    %c0_7 = arith.constant 0 : index
    %c0_8 = arith.constant 0 : index
    %7 = vector.load %arg2[%c2, %c0_7, %c0_8] : memref<3x64x128xf32, #tpu.memory_space<vmem>>, vector<1x64x128xf32>
    %8 = vector.shape_cast %7 : vector<1x64x128xf32> to vector<64x128xf32>
    %cst_9 = arith.constant dense<0.000000e+00> : vector<36x128xf32>
    %9 = tpu.matmul %0, %8, %cst_9 {dimension_numbers = #tpu.dot_dimension_numbers<[1], [0], [0], [1], [0, 0, 1, 1], [], []>} : vector<36x64xf32>, vector<64x128xf32>, vector<36x128xf32> -> vector<36x128xf32>
    %cst_10 = arith.constant 0.000000e+00 : f32
    %10 = vector.broadcast %cst_10 : f32 to vector<1x128xf32>
    %cst_11 = arith.constant 0.000000e+00 : f32
    %11 = vector.broadcast %cst_11 : f32 to vector<1x128xf32>
    %12 = vector.extract_strided_slice %3 {offsets = [0, 0], sizes = [16, 128], strides = [1, 1]} : vector<36x128xf32> to vector<16x128xf32>
    %13 = vector.extract_strided_slice %6 {offsets = [1, 0], sizes = [16, 128], strides = [1, 1]} : vector<36x128xf32> to vector<16x128xf32>
    %14 = arith.addf %12, %13 : vector<16x128xf32>
    %15 = vector.extract_strided_slice %9 {offsets = [2, 0], sizes = [16, 128], strides = [1, 1]} : vector<36x128xf32> to vector<16x128xf32>
    %16 = arith.addf %14, %15 : vector<16x128xf32>
    %cst_12 = arith.constant dense<0.000000e+00> : vector<128xf32>
    %17 = vector.multi_reduction <add>, %16, %cst_12 [0] : vector<16x128xf32> to vector<128xf32>
    %18 = vector.shape_cast %17 : vector<128xf32> to vector<1x128xf32>
    %19 = arith.addf %10, %18 : vector<1x128xf32>
    %20 = arith.mulf %16, %16 : vector<16x128xf32>
    %cst_13 = arith.constant dense<0.000000e+00> : vector<128xf32>
    %21 = vector.multi_reduction <add>, %20, %cst_13 [0] : vector<16x128xf32> to vector<128xf32>
    %22 = vector.shape_cast %21 : vector<128xf32> to vector<1x128xf32>
    %23 = arith.addf %11, %22 : vector<1x128xf32>
    %24 = vector.extract_strided_slice %3 {offsets = [18, 0], sizes = [16, 128], strides = [1, 1]} : vector<36x128xf32> to vector<16x128xf32>
    %25 = vector.extract_strided_slice %6 {offsets = [19, 0], sizes = [16, 128], strides = [1, 1]} : vector<36x128xf32> to vector<16x128xf32>
    %26 = arith.addf %24, %25 : vector<16x128xf32>
    %27 = vector.extract_strided_slice %9 {offsets = [20, 0], sizes = [16, 128], strides = [1, 1]} : vector<36x128xf32> to vector<16x128xf32>
    %28 = arith.addf %26, %27 : vector<16x128xf32>
    %cst_14 = arith.constant dense<0.000000e+00> : vector<128xf32>
    %29 = vector.multi_reduction <add>, %28, %cst_14 [0] : vector<16x128xf32> to vector<128xf32>
    %30 = vector.shape_cast %29 : vector<128xf32> to vector<1x128xf32>
    %31 = arith.addf %19, %30 : vector<1x128xf32>
    %32 = arith.mulf %28, %28 : vector<16x128xf32>
    %cst_15 = arith.constant dense<0.000000e+00> : vector<128xf32>
    %33 = vector.multi_reduction <add>, %32, %cst_15 [0] : vector<16x128xf32> to vector<128xf32>
    %34 = vector.shape_cast %33 : vector<128xf32> to vector<1x128xf32>
    %35 = arith.addf %23, %34 : vector<1x128xf32>
    %36 = tpu.concatenate %31, %35 in 0 : vector<1x128xf32>, vector<1x128xf32> -> vector<2x128xf32>
    %c0_16 = arith.constant 0 : index
    %c0_17 = arith.constant 0 : index
    %37 = vector.load %arg8[%c0_16, %c0_17] : memref<128x128xf32, #tpu.memory_space<vmem>>, vector<128x128xf32>
    %cst_18 = arith.constant dense<0.000000e+00> : vector<2x128xf32>
    %38 = tpu.matmul %36, %37, %cst_18 {dimension_numbers = #tpu.dot_dimension_numbers<[1], [0], [0], [1], [0, 0, 1, 1], [], []>} : vector<2x128xf32>, vector<128x128xf32>, vector<2x128xf32> -> vector<2x128xf32>
    %cst_19 = arith.constant 0.001953125 : f32
    %39 = vector.broadcast %cst_19 : f32 to vector<2x128xf32>
    %40 = arith.mulf %38, %39 : vector<2x128xf32>
    %41 = vector.extract_strided_slice %40 {offsets = [0, 0], sizes = [1, 128], strides = [1, 1]} : vector<2x128xf32> to vector<1x128xf32>
    %42 = vector.extract_strided_slice %40 {offsets = [1, 0], sizes = [1, 128], strides = [1, 1]} : vector<2x128xf32> to vector<1x128xf32>
    %43 = arith.mulf %41, %41 : vector<1x128xf32>
    %44 = arith.subf %42, %43 : vector<1x128xf32>
    %cst_20 = arith.constant 9.99999974E-6 : f32
    %45 = vector.broadcast %cst_20 : f32 to vector<1x128xf32>
    %46 = arith.addf %44, %45 : vector<1x128xf32>
    %47 = math.rsqrt %46 : vector<1x128xf32>
    %c0_21 = arith.constant 0 : index
    %c0_22 = arith.constant 0 : index
    %48 = vector.load %arg3[%c0_21, %c0_22] : memref<1x128xf32, #tpu.memory_space<vmem>>, vector<1x128xf32>
    %49 = arith.mulf %48, %47 : vector<1x128xf32>
    %c0_23 = arith.constant 0 : index
    %c0_24 = arith.constant 0 : index
    %50 = vector.load %arg4[%c0_23, %c0_24] : memref<1x128xf32, #tpu.memory_space<vmem>>, vector<1x128xf32>
    %51 = arith.mulf %49, %41 : vector<1x128xf32>
    %52 = arith.subf %50, %51 : vector<1x128xf32>
    %cst_25 = arith.constant 0.000000e+00 : f32
    %53 = vector.broadcast %cst_25 : f32 to vector<1x128xf32>
    %54 = vector.broadcast %49 : vector<1x128xf32> to vector<16x128xf32>
    %55 = arith.mulf %16, %54 : vector<16x128xf32>
    %56 = vector.broadcast %52 : vector<1x128xf32> to vector<16x128xf32>
    %57 = arith.addf %55, %56 : vector<16x128xf32>
    %cst_26 = arith.constant 0.000000e+00 : f32
    %58 = vector.broadcast %cst_26 : f32 to vector<16x128xf32>
    %59 = arith.maximumf %57, %58 : vector<16x128xf32>
    %60 = vector.broadcast %49 : vector<1x128xf32> to vector<16x128xf32>
    %61 = arith.mulf %28, %60 : vector<16x128xf32>
    %62 = vector.broadcast %52 : vector<1x128xf32> to vector<16x128xf32>
    %63 = arith.addf %61, %62 : vector<16x128xf32>
    %cst_27 = arith.constant 0.000000e+00 : f32
    %64 = vector.broadcast %cst_27 : f32 to vector<16x128xf32>
    %65 = arith.maximumf %63, %64 : vector<16x128xf32>
    %66 = tpu.concatenate %53, %59, %53, %53, %65, %53 in 0 : vector<1x128xf32>, vector<16x128xf32>, vector<1x128xf32>, vector<1x128xf32>, vector<16x128xf32>, vector<1x128xf32> -> vector<36x128xf32>
    %c0_28 = arith.constant 0 : index
    %c0_29 = arith.constant 0 : index
    %c0_30 = arith.constant 0 : index
    %67 = vector.load %arg5[%c0_28, %c0_29, %c0_30] : memref<3x128x128xf32, #tpu.memory_space<vmem>>, vector<1x128x128xf32>
    %68 = vector.shape_cast %67 : vector<1x128x128xf32> to vector<128x128xf32>
    %cst_31 = arith.constant dense<0.000000e+00> : vector<36x128xf32>
    %69 = tpu.matmul %66, %68, %cst_31 {dimension_numbers = #tpu.dot_dimension_numbers<[1], [0], [0], [1], [0, 0, 1, 1], [], []>} : vector<36x128xf32>, vector<128x128xf32>, vector<36x128xf32> -> vector<36x128xf32>
    %c1_32 = arith.constant 1 : index
    %c0_33 = arith.constant 0 : index
    %c0_34 = arith.constant 0 : index
    %70 = vector.load %arg5[%c1_32, %c0_33, %c0_34] : memref<3x128x128xf32, #tpu.memory_space<vmem>>, vector<1x128x128xf32>
    %71 = vector.shape_cast %70 : vector<1x128x128xf32> to vector<128x128xf32>
    %cst_35 = arith.constant dense<0.000000e+00> : vector<36x128xf32>
    %72 = tpu.matmul %66, %71, %cst_35 {dimension_numbers = #tpu.dot_dimension_numbers<[1], [0], [0], [1], [0, 0, 1, 1], [], []>} : vector<36x128xf32>, vector<128x128xf32>, vector<36x128xf32> -> vector<36x128xf32>
    %c2_36 = arith.constant 2 : index
    %c0_37 = arith.constant 0 : index
    %c0_38 = arith.constant 0 : index
    %73 = vector.load %arg5[%c2_36, %c0_37, %c0_38] : memref<3x128x128xf32, #tpu.memory_space<vmem>>, vector<1x128x128xf32>
    %74 = vector.shape_cast %73 : vector<1x128x128xf32> to vector<128x128xf32>
    %cst_39 = arith.constant dense<0.000000e+00> : vector<36x128xf32>
    %75 = tpu.matmul %66, %74, %cst_39 {dimension_numbers = #tpu.dot_dimension_numbers<[1], [0], [0], [1], [0, 0, 1, 1], [], []>} : vector<36x128xf32>, vector<128x128xf32>, vector<36x128xf32> -> vector<36x128xf32>
    %cst_40 = arith.constant 0.000000e+00 : f32
    %76 = vector.broadcast %cst_40 : f32 to vector<1x128xf32>
    %cst_41 = arith.constant 0.000000e+00 : f32
    %77 = vector.broadcast %cst_41 : f32 to vector<1x128xf32>
    %78 = vector.extract_strided_slice %69 {offsets = [0, 0], sizes = [16, 128], strides = [1, 1]} : vector<36x128xf32> to vector<16x128xf32>
    %79 = vector.extract_strided_slice %72 {offsets = [1, 0], sizes = [16, 128], strides = [1, 1]} : vector<36x128xf32> to vector<16x128xf32>
    %80 = arith.addf %78, %79 : vector<16x128xf32>
    %81 = vector.extract_strided_slice %75 {offsets = [2, 0], sizes = [16, 128], strides = [1, 1]} : vector<36x128xf32> to vector<16x128xf32>
    %82 = arith.addf %80, %81 : vector<16x128xf32>
    %cst_42 = arith.constant dense<0.000000e+00> : vector<128xf32>
    %83 = vector.multi_reduction <add>, %82, %cst_42 [0] : vector<16x128xf32> to vector<128xf32>
    %84 = vector.shape_cast %83 : vector<128xf32> to vector<1x128xf32>
    %85 = arith.addf %76, %84 : vector<1x128xf32>
    %86 = arith.mulf %82, %82 : vector<16x128xf32>
    %cst_43 = arith.constant dense<0.000000e+00> : vector<128xf32>
    %87 = vector.multi_reduction <add>, %86, %cst_43 [0] : vector<16x128xf32> to vector<128xf32>
    %88 = vector.shape_cast %87 : vector<128xf32> to vector<1x128xf32>
    %89 = arith.addf %77, %88 : vector<1x128xf32>
    %90 = vector.extract_strided_slice %69 {offsets = [18, 0], sizes = [16, 128], strides = [1, 1]} : vector<36x128xf32> to vector<16x128xf32>
    %91 = vector.extract_strided_slice %72 {offsets = [19, 0], sizes = [16, 128], strides = [1, 1]} : vector<36x128xf32> to vector<16x128xf32>
    %92 = arith.addf %90, %91 : vector<16x128xf32>
    %93 = vector.extract_strided_slice %75 {offsets = [20, 0], sizes = [16, 128], strides = [1, 1]} : vector<36x128xf32> to vector<16x128xf32>
    %94 = arith.addf %92, %93 : vector<16x128xf32>
    %cst_44 = arith.constant dense<0.000000e+00> : vector<128xf32>
    %95 = vector.multi_reduction <add>, %94, %cst_44 [0] : vector<16x128xf32> to vector<128xf32>
    %96 = vector.shape_cast %95 : vector<128xf32> to vector<1x128xf32>
    %97 = arith.addf %85, %96 : vector<1x128xf32>
    %98 = arith.mulf %94, %94 : vector<16x128xf32>
    %cst_45 = arith.constant dense<0.000000e+00> : vector<128xf32>
    %99 = vector.multi_reduction <add>, %98, %cst_45 [0] : vector<16x128xf32> to vector<128xf32>
    %100 = vector.shape_cast %99 : vector<128xf32> to vector<1x128xf32>
    %101 = arith.addf %89, %100 : vector<1x128xf32>
    %102 = tpu.concatenate %97, %101 in 0 : vector<1x128xf32>, vector<1x128xf32> -> vector<2x128xf32>
    %c0_46 = arith.constant 0 : index
    %c0_47 = arith.constant 0 : index
    %103 = vector.load %arg8[%c0_46, %c0_47] : memref<128x128xf32, #tpu.memory_space<vmem>>, vector<128x128xf32>
    %cst_48 = arith.constant dense<0.000000e+00> : vector<2x128xf32>
    %104 = tpu.matmul %102, %103, %cst_48 {dimension_numbers = #tpu.dot_dimension_numbers<[1], [0], [0], [1], [0, 0, 1, 1], [], []>} : vector<2x128xf32>, vector<128x128xf32>, vector<2x128xf32> -> vector<2x128xf32>
    %cst_49 = arith.constant 0.001953125 : f32
    %105 = vector.broadcast %cst_49 : f32 to vector<2x128xf32>
    %106 = arith.mulf %104, %105 : vector<2x128xf32>
    %107 = vector.extract_strided_slice %106 {offsets = [0, 0], sizes = [1, 128], strides = [1, 1]} : vector<2x128xf32> to vector<1x128xf32>
    %108 = vector.extract_strided_slice %106 {offsets = [1, 0], sizes = [1, 128], strides = [1, 1]} : vector<2x128xf32> to vector<1x128xf32>
    %109 = arith.mulf %107, %107 : vector<1x128xf32>
    %110 = arith.subf %108, %109 : vector<1x128xf32>
    %cst_50 = arith.constant 9.99999974E-6 : f32
    %111 = vector.broadcast %cst_50 : f32 to vector<1x128xf32>
    %112 = arith.addf %110, %111 : vector<1x128xf32>
    %113 = math.rsqrt %112 : vector<1x128xf32>
    %c0_51 = arith.constant 0 : index
    %c0_52 = arith.constant 0 : index
    %114 = vector.load %arg6[%c0_51, %c0_52] : memref<1x128xf32, #tpu.memory_space<vmem>>, vector<1x128xf32>
    %115 = arith.mulf %114, %113 : vector<1x128xf32>
    %c0_53 = arith.constant 0 : index
    %c0_54 = arith.constant 0 : index
    %116 = vector.load %arg7[%c0_53, %c0_54] : memref<1x128xf32, #tpu.memory_space<vmem>>, vector<1x128xf32>
    %117 = arith.mulf %115, %107 : vector<1x128xf32>
    %118 = arith.subf %116, %117 : vector<1x128xf32>
    %c0_55 = arith.constant 0 : index
    %c0_56 = arith.constant 0 : index
    %119 = vector.load %arg9[%c0_55, %c0_56] : memref<64x128xf32, #tpu.memory_space<vmem>>, vector<64x128xf32>
    %cst_57 = arith.constant dense<0.000000e+00> : vector<36x128xf32>
    %120 = tpu.matmul %0, %119, %cst_57 {dimension_numbers = #tpu.dot_dimension_numbers<[1], [0], [0], [1], [0, 0, 1, 1], [], []>} : vector<36x64xf32>, vector<64x128xf32>, vector<36x128xf32> -> vector<36x128xf32>
    %c0_58 = arith.constant 0 : index
    %c0_59 = arith.constant 0 : index
    %121 = vector.load %arg10[%c0_58, %c0_59] : memref<1x128xf32, #tpu.memory_space<vmem>>, vector<1x128xf32>
    %122 = vector.broadcast %121 : vector<1x128xf32> to vector<36x128xf32>
    %123 = arith.addf %120, %122 : vector<36x128xf32>
    %124 = vector.broadcast %115 : vector<1x128xf32> to vector<16x128xf32>
    %125 = arith.mulf %82, %124 : vector<16x128xf32>
    %126 = vector.broadcast %118 : vector<1x128xf32> to vector<16x128xf32>
    %127 = arith.addf %125, %126 : vector<16x128xf32>
    %128 = vector.extract_strided_slice %123 {offsets = [1, 0], sizes = [16, 128], strides = [1, 1]} : vector<36x128xf32> to vector<16x128xf32>
    %129 = arith.addf %127, %128 : vector<16x128xf32>
    %cst_60 = arith.constant 0.000000e+00 : f32
    %130 = vector.broadcast %cst_60 : f32 to vector<16x128xf32>
    %131 = arith.maximumf %129, %130 : vector<16x128xf32>
    %c0_61 = arith.constant 0 : index
    %c0_62 = arith.constant 0 : index
    %c0_63 = arith.constant 0 : index
    %132 = vector.load %arg11[%c0_61, %c0_62, %c0_63] : memref<2x16x128xf32, #tpu.memory_space<vmem>>, vector<1x16x128xf32>
    %133 = vector.shape_cast %132 : vector<1x16x128xf32> to vector<16x128xf32>
    %134 = vector.shape_cast %131 : vector<16x128xf32> to vector<1x16x128xf32>
    tpu.vector_store %arg11[%c0_61, %c0_62, %c0_63], %134 {strides = array<i32>} : memref<2x16x128xf32, #tpu.memory_space<vmem>>, vector<1x16x128xf32>,
    %135 = vector.broadcast %115 : vector<1x128xf32> to vector<16x128xf32>
    %136 = arith.mulf %94, %135 : vector<16x128xf32>
    %137 = vector.broadcast %118 : vector<1x128xf32> to vector<16x128xf32>
    %138 = arith.addf %136, %137 : vector<16x128xf32>
    %139 = vector.extract_strided_slice %123 {offsets = [19, 0], sizes = [16, 128], strides = [1, 1]} : vector<36x128xf32> to vector<16x128xf32>
    %140 = arith.addf %138, %139 : vector<16x128xf32>
    %cst_64 = arith.constant 0.000000e+00 : f32
    %141 = vector.broadcast %cst_64 : f32 to vector<16x128xf32>
    %142 = arith.maximumf %140, %141 : vector<16x128xf32>
    %c1_65 = arith.constant 1 : index
    %c0_66 = arith.constant 0 : index
    %c0_67 = arith.constant 0 : index
    %143 = vector.load %arg11[%c1_65, %c0_66, %c0_67] : memref<2x16x128xf32, #tpu.memory_space<vmem>>, vector<1x16x128xf32>
    %144 = vector.shape_cast %143 : vector<1x16x128xf32> to vector<16x128xf32>
    %145 = vector.shape_cast %142 : vector<16x128xf32> to vector<1x16x128xf32>
    tpu.vector_store %arg11[%c1_65, %c0_66, %c0_67], %145 {strides = array<i32>} : memref<2x16x128xf32, #tpu.memory_space<vmem>>, vector<1x16x128xf32>,
    return
  }
  func.func @transform_0(%arg0: i32) -> (i32, i32) {
    %c0_i32 = arith.constant 0 : i32
    %c0_i32_0 = arith.constant 0 : i32
    %c0_i32_1 = arith.constant 0 : i32
    return %c0_i32, %c0_i32_0 : i32, i32
  }
  func.func @transform_1(%arg0: i32) -> (i32, i32, i32) {
    %c0_i32 = arith.constant 0 : i32
    %c0_i32_0 = arith.constant 0 : i32
    %c0_i32_1 = arith.constant 0 : i32
    %c0_i32_2 = arith.constant 0 : i32
    return %c0_i32, %c0_i32_0, %c0_i32_1 : i32, i32, i32
  }
  func.func @transform_2(%arg0: i32) -> (i32, i32) {
    %c0_i32 = arith.constant 0 : i32
    %c0_i32_0 = arith.constant 0 : i32
    %c0_i32_1 = arith.constant 0 : i32
    return %c0_i32, %c0_i32_0 : i32, i32
  }
  func.func @transform_3(%arg0: i32) -> (i32, i32) {
    %c0_i32 = arith.constant 0 : i32
    %c0_i32_0 = arith.constant 0 : i32
    %c0_i32_1 = arith.constant 0 : i32
    return %c0_i32, %c0_i32_0 : i32, i32
  }
  func.func @transform_4(%arg0: i32) -> (i32, i32, i32) {
    %c0_i32 = arith.constant 0 : i32
    %c0_i32_0 = arith.constant 0 : i32
    %c0_i32_1 = arith.constant 0 : i32
    %c0_i32_2 = arith.constant 0 : i32
    return %c0_i32, %c0_i32_0, %c0_i32_1 : i32, i32, i32
  }
  func.func @transform_5(%arg0: i32) -> (i32, i32) {
    %c0_i32 = arith.constant 0 : i32
    %c0_i32_0 = arith.constant 0 : i32
    %c0_i32_1 = arith.constant 0 : i32
    return %c0_i32, %c0_i32_0 : i32, i32
  }
  func.func @transform_6(%arg0: i32) -> (i32, i32) {
    %c0_i32 = arith.constant 0 : i32
    %c0_i32_0 = arith.constant 0 : i32
    %c0_i32_1 = arith.constant 0 : i32
    return %c0_i32, %c0_i32_0 : i32, i32
  }
  func.func @transform_7(%arg0: i32) -> (i32, i32) {
    %c0_i32 = arith.constant 0 : i32
    %c0_i32_0 = arith.constant 0 : i32
    %c0_i32_1 = arith.constant 0 : i32
    return %c0_i32, %c0_i32_0 : i32, i32
  }
  func.func @transform_8(%arg0: i32) -> (i32, i32) {
    %c0_i32 = arith.constant 0 : i32
    %c0_i32_0 = arith.constant 0 : i32
    %c0_i32_1 = arith.constant 0 : i32
    return %c0_i32, %c0_i32_0 : i32, i32
  }
  func.func @transform_9(%arg0: i32) -> (i32, i32) {
    %c0_i32 = arith.constant 0 : i32
    %c0_i32_0 = arith.constant 0 : i32
    %c0_i32_1 = arith.constant 0 : i32
    return %c0_i32, %c0_i32_0 : i32, i32
  }
  func.func @transform_10(%arg0: i32) -> (i32, i32, i32) {
    %c0_i32 = arith.constant 0 : i32
    %c0_i32_0 = arith.constant 0 : i32
    %c0_i32_1 = arith.constant 0 : i32
    %c0_i32_2 = arith.constant 0 : i32
    return %c0_i32, %c0_i32_0, %c0_i32_1 : i32, i32, i32
  }
}

</mosaic_0001>

<bundles_post_ra>
// kernel: tpu_custom_call.1
= control target key start
LH: loop header
LB: loop body
LE: loop exit
PB: predicated region body
PF: predicated region fallthrough
CT: control target
= control target key end

     0   :  { %15 = vsyncpa [#allocation3], 0  ;;  %s2622_s0 = inlined_call_operand.hbm [shape: f32[36,64], index: 0, kind: input, shape index: {}]   ;;  %s2623_s1 = inlined_call_operand.hbm [shape: f32[3,64,128], index: 1, kind: input, shape index: {}]   ;;  %s2624_s2 = inlined_call_operand.vmem [shape: f32[1,128], index: 2, kind: input, shape index: {}]   ;;  %s2625_s3 = inlined_call_operand.vmem [shape: f32[1,128], index: 3, kind: input, shape index: {}]   ;;  %s2626_s4 = inlined_call_operand.hbm [shape: f32[3,128,128], index: 4, kind: input, shape index: {}]   ;;  %s2627_s5 = inlined_call_operand.vmem [shape: f32[1,128], index: 5, kind: input, shape index: {}]   ;;  %s2628_s6 = inlined_call_operand.vmem [shape: f32[1,128], index: 6, kind: input, shape index: {}]   ;;  %s2629_s7 = inlined_call_operand.hbm [shape: f32[128,128], index: 7, kind: input, shape index: {}]   ;;  %s2630_s8 = inlined_call_operand.hbm [shape: f32[64,128], index: 8, kind: input, shape index: {}]   ;;  %s2631_s9 = inlined_call_operand.vmem [shape: f32[1,128], index: 9, kind: input, shape index: {}]   ;;  %s2632_s10 = inlined_call_operand.hbm [shape: f32[2,16,128], index: 10, kind: output, shape index: {}]  }
   0x1   :  { %16 = vsyncpa [#allocation6], 0 }
   0x2   :  { %17 = vsyncpa [#allocation9], 0 }
   0x3   :  { %18 = vsyncpa [#allocation4], 0  ;;  %s2064_s13 = smov [#allocation5]   ;;  %s2065_s15 = smov [#allocation8]  }
   0x4   :  { %s36_s14 = sshll.u32 %s2064_s13, 4  ;;  %s68_s16 = sshll.u32 %s2065_s15, 4  ;;  %s37_s14 = int_to_ptr.vmem [resolvable:$true] %s36_s14  ;;  %s69_s16 = int_to_ptr.vmem [resolvable:$true] %s68_s16 }
   0x5   :  { %s1944_s17 = scalar_lea.vmem %s37_s14, 3072  ;;  %p1949_p1 = scmp.lt.s32.totalorder %s37_s14, %s37_s14 }
   0x6   :  { %p1945_p0 = scmp.ne.s32.totalorder %s37_s14, %s1944_s17  ;;  %p1950_p2 = scmp.lt.s32.totalorder %s1944_s17, %s1944_s17 }
   0x8   :  { %p1951_p3 = por %p1950_p2, %p1949_p1 }
   0xa   :  { %p1952_p4 = pnand %p1951_p3, %p1945_p0 }
   0xc   :  { %1955 = shalt.err (!%p1952_p4)
}
   0xd   :  { %s2066_s18 = smov 128   ;;  %s2067_s19 = smov 8  }
   0xe   :  { %42 = dma.hbm_to_vmem [thread:$0]  %s2623_s1, 3072, %s37_s14, [#allocation6], %s2066_s18, %s2066_s18, %s2067_s19  }
   0xf   :  { %s1964_s22 = scalar_lea.vmem %s69_s16, 2048  ;;  %p1969_p6 = scmp.lt.s32.totalorder %s69_s16, %s69_s16 }
  0x10   :  { %p1965_p5 = scmp.ne.s32.totalorder %s69_s16, %s1964_s22  ;;  %p1970_p7 = scmp.lt.s32.totalorder %s1964_s22, %s1964_s22 }
  0x12   :  { %p1971_p8 = por %p1970_p7, %p1969_p6 }
  0x14   :  { %p1972_p9 = pnand %p1971_p8, %p1965_p5 }
  0x16   :  { %1975 = shalt.err (!%p1972_p9)
}
  0x17   :  { %74 = dma.hbm_to_vmem [thread:$0]  %s2629_s7, 2048, %s69_s16, [#allocation9], %s2066_s18, %s2066_s18, %s2067_s19  }
  0x18   :  { %s2068_s25 = smov [#allocation2]   ;;  %s2069_s27 = smov [#allocation7]  }
  0x19   :  { %s24_s26 = sshll.u32 %s2068_s25, 4  ;;  %s52_s28 = sshll.u32 %s2069_s27, 4  ;;  %s25_s26 = int_to_ptr.vmem [resolvable:$true] %s24_s26  ;;  %s53_s28 = int_to_ptr.vmem [resolvable:$true] %s52_s28 }
  0x1a   :  { %s1984_s1 = scalar_lea.vmem %s25_s26, 640  ;;  %p1989_p11 = scmp.lt.s32.totalorder %s25_s26, %s25_s26 }
  0x1b   :  { %p1985_p10 = scmp.ne.s32.totalorder %s25_s26, %s1984_s1  ;;  %p1990_p12 = scmp.lt.s32.totalorder %s1984_s1, %s1984_s1 }
  0x1d   :  { %p1991_p13 = por %p1990_p12, %p1989_p11 }
  0x1f   :  { %p1992_p0 = pnand %p1991_p13, %p1985_p10 }
  0x21   :  { %1995 = shalt.err (!%p1992_p0)
}
  0x22   :  { %30 = dma.hbm_to_vmem [thread:$0]  %s2622_s0, 640, %s25_s26, [#allocation3], %s2066_s18, %s2066_s18, %s2067_s19  }
  0x23   :  { %s2004_s7 = scalar_lea.vmem %s53_s28, 6144  ;;  %p2009_p2 = scmp.lt.s32.totalorder %s53_s28, %s53_s28 }
  0x24   :  { %p2005_p1 = scmp.ne.s32.totalorder %s53_s28, %s2004_s7  ;;  %p2010_p3 = scmp.lt.s32.totalorder %s2004_s7, %s2004_s7 }
  0x26   :  { %p2011_p4 = por %p2010_p3, %p2009_p2 }
  0x28   :  { %p2012_p5 = pnand %p2011_p4, %p2005_p1 }
  0x2a   :  { %2015 = shalt.err (!%p2012_p5)
}
  0x2b   :  { %58 = dma.hbm_to_vmem [thread:$0]  %s2626_s4, 6144, %s53_s28, [#allocation6], %s2066_s18, %s2066_s18, %s2067_s19  }
  0x2c   :  { %s2070_s13 = smov [#allocation10]  }
  0x2d   :  { %s80_s14 = sshll.u32 %s2070_s13, 4  ;;  %s81_s14 = int_to_ptr.vmem [resolvable:$true] %s80_s14 }
  0x2e   :  { %s2024_s15 = scalar_lea.vmem %s81_s14, 1024  ;;  %p2029_p7 = scmp.lt.s32.totalorder %s81_s14, %s81_s14 }
  0x2f   :  { %p2025_p6 = scmp.ne.s32.totalorder %s81_s14, %s2024_s15  ;;  %p2030_p8 = scmp.lt.s32.totalorder %s2024_s15, %s2024_s15 }
  0x31   :  { %p2031_p9 = por %p2030_p8, %p2029_p7 }
  0x33   :  { %p2032_p10 = pnand %p2031_p9, %p2025_p6 }
  0x35   :  { %2035 = shalt.err (!%p2032_p10)
}
  0x36   :  { %86 = dma.hbm_to_vmem [thread:$0]  %s2630_s8, 1024, %s81_s14, [#allocation9], %s2066_s18, %s2066_s18, %s2067_s19  }
  0x37   :  { %2056 = dma.done.wait [#allocation3], 640  }
  0x38   :  { %2057 = vsyncadd [#allocation3], 4294966656 }
  0x39   :  { %2058 = dma.done.wait [#allocation6], 9216  }
  0x3a   :  { %2059 = vsyncadd [#allocation6], 4294958080 }
  0x3b   :  { %2060 = dma.done.wait [#allocation9], 3072  }
  0x3c   :  { %2061 = vsyncadd [#allocation9], 4294964224  ;;  %v2071_v0 = vmov 0.0   ;;  %vm2072_vm0 = vmmov 0   ;;  %v116_v1 = vld [vmem:[#allocation5 + $0x38] sm:$0xff]  ;;  %v115_v2 = vld [vmem:[#allocation5 + $0x30] sm:$0xff] }
  0x3d   :  { %1585 = vmatprep.subr.mxu1 %v2071_v0  ;;  %1601 = vmatprep.mubr.msk.f32.mxu1 %vm2072_vm0, %v2071_v0  ;;  %v114_v3 = vld [vmem:[#allocation5 + $0x28] sm:$0xff]  ;;  %v113_v4 = vld [vmem:[#allocation5 + $0x20] sm:$0xff]  ;;  %v330_v5 = vld [vmem:[#allocation5 + $0xb8] sm:$0xff]  ;;  %vm117_vm1 = vcmask 523264   ;;  %vm424_vm2 = vcmask 1046528   ;;  %vm437_vm3 = vcmask 1045504  }
  0x3e   :  { %1647 = vmatprep.subr.mxu0 %v2071_v0  ;;  %1663 = vmatprep.mubr.msk.f32.mxu0 %vm2072_vm0, %v2071_v0  ;;  %v329_v6 = vld [vmem:[#allocation5 + $0xb0] sm:$0xff]  ;;  %v112_v7 = vld [vmem:[#allocation5 + $0x18] sm:$0xff]  ;;  %v328_v8 = vld [vmem:[#allocation5 + $0xa8] sm:$0xff]  ;;  %vm528_vm4 = vcmask 1040384   ;;  %vm694_vm6 = vcmask 1041408   ;;  %vm696_vm7 = vcmask 1042432  }
  0x3f   :  { %1586 = vmatpush3.msra.mxu1 %v116_v1  ;;  %1648 = vmatpush3.msra.mxu0 %v330_v5  ;;  %v111_v9 = vld [vmem:[#allocation5 + $0x10] sm:$0xff]  ;;  %v327_v10 = vld [vmem:[#allocation5 + $0xa0] sm:$0xff]  ;;  %v110_v11 = vld [vmem:[#allocation5 + $0x8] sm:$0xff] }
  0x40   :  { %1587 = vmatprep.subr.mxu1 %v2071_v0  ;;  %1649 = vmatprep.subr.mxu0 %v2071_v0  ;;  %v326_v12 = vld [vmem:[#allocation5 + $0x98] sm:$0xff]  ;;  %v109_v13 = vld [vmem:[#allocation5] sm:$0xff]  ;;  %v325_v14 = vld [vmem:[#allocation5 + $0x90] sm:$0xff] }
  0x41   :  { %1588 = vmatpush3.msra.mxu1 %v115_v2  ;;  %1650 = vmatpush3.msra.mxu0 %v329_v6  ;;  %v104_v15 = vld [vmem:[#allocation2] sm:$0xff]  ;;  %v230_v17 = vld [vmem:[#allocation5 + $0x70] sm:$0xff]  ;;  %v324_v18 = vld [vmem:[#allocation5 + $0x88] sm:$0xff] }
  0x42   :  { %1589 = vmatprep.subr.mxu1 %v2071_v0  ;;  %1651 = vmatprep.subr.mxu0 %v2071_v0  ;;  %v231_v16 = vld [vmem:[#allocation5 + $0x78] sm:$0xff]  ;;  %v2182_v19 = vld [vmem:[#allocation2 + $0x8] sm:$0xff]  ;;  %v229_v20 = vld [vmem:[#allocation5 + $0x68] sm:$0xff] }
  0x43   :  { %1590 = vmatpush3.msra.mxu1 %v114_v3  ;;  %1652 = vmatpush3.msra.mxu0 %v328_v8  ;;  %v228_v21 = vld [vmem:[#allocation5 + $0x60] sm:$0xff]  ;;  %v2191_v23 = vld [vmem:[#allocation2 + $0x10] sm:$0xff]  ;;  %v227_v24 = vld [vmem:[#allocation5 + $0x58] sm:$0xff] }
  0x44   :  { %1591 = vmatprep.subr.mxu1 %v2071_v0  ;;  %1653 = vmatprep.subr.mxu0 %v2071_v0  ;;  %v323_v22 = vld [vmem:[#allocation5 + $0x80] sm:$0xff]  ;;  %v226_v25 = vld [vmem:[#allocation5 + $0x50] sm:$0xff]  ;;  %v225_v27 = vld [vmem:[#allocation5 + $0x48] sm:$0xff] }
  0x45   :  { %1592 = vmatpush3.msra.mxu1 %v113_v4  ;;  %1654 = vmatpush3.msra.mxu0 %v327_v10  ;;  %v2200_v26 = vld [vmem:[#allocation2 + $0x18] sm:$0xff]  ;;  %v224_v28 = vld [vmem:[#allocation5 + $0x40] sm:$0xff]  ;;  %v2211_v29 = vld [vmem:[#allocation2 + $0x20] sm:$0xf] }
  0x46   :  { %1593 = vmatprep.subr.mxu1 %v2071_v0  ;;  %1655 = vmatprep.subr.mxu0 %v2071_v0  ;;  %v2255_v30 = vld [vmem:[#allocation8 + $0x78] sm:$0xff]  ;;  %v2259_v31 = vld [vmem:[#allocation8 + $0x70] sm:$0xff]  ;;  %v2263_v32 = vld [vmem:[#allocation8 + $0x68] sm:$0xff] }
  0x47   :  { %1594 = vmatpush3.msra.mxu1 %v112_v7  ;;  %1656 = vmatpush3.msra.mxu0 %v326_v12  ;;  %v2267_v33 = vld [vmem:[#allocation8 + $0x60] sm:$0xff]  ;;  %v2271_v34 = vld [vmem:[#allocation8 + $0x58] sm:$0xff]  ;;  %v2275_v35 = vld [vmem:[#allocation8 + $0x50] sm:$0xff] }
  0x48   :  { %1595 = vmatprep.subr.mxu1 %v2071_v0  ;;  %1657 = vmatprep.subr.mxu0 %v2071_v0  ;;  %v2279_v36 = vld [vmem:[#allocation8 + $0x48] sm:$0xff]  ;;  %v2283_v37 = vld [vmem:[#allocation8 + $0x40] sm:$0xff]  ;;  %v2287_v38 = vld [vmem:[#allocation8 + $0x38] sm:$0xff] }
  0x49   :  { %1596 = vmatpush3.msra.mxu1 %v111_v9  ;;  %1658 = vmatpush3.msra.mxu0 %v325_v14  ;;  %v2290_v39 = vld [vmem:[#allocation8 + $0x30] sm:$0xff]  ;;  %v2293_v40 = vld [vmem:[#allocation8 + $0x28] sm:$0xff]  ;;  %v2297_v41 = vld [vmem:[#allocation8 + $0x20] sm:$0xff] }
  0x4a   :  { %1597 = vmatprep.subr.mxu1 %v2071_v0  ;;  %1659 = vmatprep.subr.mxu0 %v2071_v0  ;;  %v2301_v42 = vld [vmem:[#allocation8 + $0x18] sm:$0xff]  ;;  %v2305_v43 = vld [vmem:[#allocation8 + $0x10] sm:$0xff]  ;;  %v2309_v44 = vld [vmem:[#allocation8 + $0x8] sm:$0xff] }
  0x4b   :  { %1598 = vmatpush3.msra.mxu1 %v110_v11  ;;  %1660 = vmatpush3.msra.mxu0 %v324_v18  ;;  %v2313_v45 = vld [vmem:[#allocation8] sm:$0xff]  ;;  %vm2409_vm5 = vmneg %vm528_vm4 }
  0x4c   :  { %1599 = vmatprep.subr.mxu1 %v2071_v0  ;;  %1661 = vmatprep.subr.mxu0 %v2071_v0 }
  0x4d   :  { %1600 = vmatpush3.msra.mxu1 %v109_v13  ;;  %1662 = vmatpush3.msra.mxu0 %v323_v22 }
  0x4e   :  { %1602 = vmatmul.mubr.msk.f32.vlgmr.msra.gmra.mxu1 %vm117_vm1, %v104_v15  ;;  %1616 = vmatprep.subr.mxu1 %v2071_v0 }
  0x4f   :  { %1617 = vmatpush3.msra.mxu1 %v231_v16  ;;  %1604 = vmatprep.mubr.msk.f32.mxu1 %vm2072_vm0, %v2071_v0 }
  0x50   :  { %1618 = vmatprep.subr.mxu1 %v2071_v0  ;;  %1664 = vmatmul.mubr.msk.f32.vlgmr.msra.gmra.mxu0 %vm117_vm1, %v104_v15 }
  0x51   :  { %1619 = vmatpush3.msra.mxu1 %v230_v17  ;;  %1666 = vmatprep.mubr.msk.f32.mxu0 %vm2072_vm0, %v2071_v0 }
  0x52   :  { %1605 = vmatmul.mubr.msk.f32.gmra.mxu1 %vm117_vm1, %v2182_v19  ;;  %1620 = vmatprep.subr.mxu1 %v2071_v0 }
  0x53   :  { %1621 = vmatpush3.msra.mxu1 %v229_v20  ;;  %1607 = vmatprep.mubr.msk.f32.mxu1 %vm2072_vm0, %v2071_v0 }
  0x54   :  { %1622 = vmatprep.subr.mxu1 %v2071_v0  ;;  %1667 = vmatmul.mubr.msk.f32.gmra.mxu0 %vm117_vm1, %v2182_v19 }
  0x55   :  { %1623 = vmatpush3.msra.mxu1 %v228_v21  ;;  %1669 = vmatprep.mubr.msk.f32.mxu0 %vm2072_vm0, %v2071_v0 }
  0x56   :  { %1608 = vmatmul.mubr.msk.f32.gmra.mxu1 %vm117_vm1, %v2191_v23  ;;  %1624 = vmatprep.subr.mxu1 %v2071_v0 }
  0x57   :  { %1610 = vmatprep.mubr.msk.f32.mxu1 %vm2072_vm0, %v2071_v0  ;;  %1625 = vmatpush3.msra.mxu1 %v227_v24 }
  0x58   :  { %1626 = vmatprep.subr.mxu1 %v2071_v0  ;;  %1713 = vmatprep.subr.mxu0 %v2071_v0 }
  0x59   :  { %1627 = vmatpush3.msra.mxu1 %v226_v25  ;;  %1670 = vmatmul.mubr.msk.f32.gmra.mxu0 %vm117_vm1, %v2191_v23 }
  0x5a   :  { %1611 = vmatmul.mubr.msk.f32.gmra.mxu1 %vm117_vm1, %v2200_v26  ;;  %1628 = vmatprep.subr.mxu1 %v2071_v0 }
  0x5b   :  { %1613 = vmatprep.mubr.msk.f32.mxu1 %vm2072_vm0, %v2071_v0  ;;  %1629 = vmatpush3.msra.mxu1 %v225_v27 }
  0x5c   :  { %1630 = vmatprep.subr.mxu1 %v2071_v0  ;;  %1672 = vmatprep.mubr.msk.f32.mxu0 %vm2072_vm0, %v2071_v0 }
  0x5d   :  { %1631 = vmatpush3.msra.mxu1 %v224_v28  ;;  %1673 = vmatmul.mubr.msk.f32.gmra.mxu0 %vm117_vm1, %v2200_v26 }
  0x5e   :  { %1614 = vmatmul.mubr.msk.f32.gmra.mxu1 %vm117_vm1, %v2211_v29  ;;  %1678 = vmatprep.subr.mxu1 %v2071_v0 }
  0x5f   :  { %1632 = vmatprep.mubr.msk.f32.mxu1 %vm2072_vm0, %v2071_v0  ;;  %1675 = vmatprep.mubr.msk.f32.mxu0 %vm2072_vm0, %v2071_v0 }
  0x61   :  { %1676 = vmatmul.mubr.msk.f32.gmra.mxu0 %vm117_vm1, %v2211_v29 }
  0x62   :  { %1633 = vmatmul.mubr.msk.f32.vlgmr.msra.gmra.mxu1 %vm117_vm1, %v104_v15  ;;  %1745 = vmatprep.mubr.msk.f32.mxu0 %vm2072_vm0, %v2071_v0 }
  0x63   :  { %1635 = vmatprep.mubr.msk.f32.mxu1 %vm2072_vm0, %v2071_v0  ;;  %1679 = vmatpush3.msra.mxu1 %v2255_v30 }
  0x64   :  { %1680 = vmatprep.subr.mxu1 %v2071_v0 }
  0x65   :  { %1681 = vmatpush3.msra.mxu1 %v2259_v31 }
  0x66   :  { %1636 = vmatmul.mubr.msk.f32.gmra.mxu1 %vm117_vm1, %v2182_v19  ;;  %1682 = vmatprep.subr.mxu1 %v2071_v0 }
  0x67   :  { %1638 = vmatprep.mubr.msk.f32.mxu1 %vm2072_vm0, %v2071_v0  ;;  %1683 = vmatpush3.msra.mxu1 %v2263_v32 }
  0x68   :  { %1684 = vmatprep.subr.mxu1 %v2071_v0 }
  0x69   :  { %1685 = vmatpush3.msra.mxu1 %v2267_v33 }
  0x6a   :  { %1639 = vmatmul.mubr.msk.f32.gmra.mxu1 %vm117_vm1, %v2191_v23  ;;  %1686 = vmatprep.subr.mxu1 %v2071_v0 }
  0x6b   :  { %1641 = vmatprep.mubr.msk.f32.mxu1 %vm2072_vm0, %v2071_v0  ;;  %1687 = vmatpush3.msra.mxu1 %v2271_v34 }
  0x6c   :  { %1688 = vmatprep.subr.mxu1 %v2071_v0 }
  0x6d   :  { %1689 = vmatpush3.msra.mxu1 %v2275_v35 }
  0x6e   :  { %1642 = vmatmul.mubr.msk.f32.gmra.mxu1 %vm117_vm1, %v2200_v26  ;;  %1690 = vmatprep.subr.mxu1 %v2071_v0 }
  0x6f   :  { %1644 = vmatprep.mubr.msk.f32.mxu1 %vm2072_vm0, %v2071_v0  ;;  %1691 = vmatpush3.msra.mxu1 %v2279_v36 }
  0x70   :  { %1692 = vmatprep.subr.mxu1 %v2071_v0 }
  0x71   :  { %1693 = vmatpush3.msra.mxu1 %v2283_v37 }
  0x72   :  { %1645 = vmatmul.mubr.msk.f32.gmra.mxu1 %vm117_vm1, %v2211_v29  ;;  %1694 = vmatprep.subr.mxu1 %v2071_v0 }
  0x73   :  { %1710 = vmatprep.mubr.msk.f32.mxu1 %vm2072_vm0, %v2071_v0  ;;  %1695 = vmatpush3.msra.mxu1 %v2287_v38 }
  0x74   :  { %1696 = vmatprep.subr.mxu1 %v2071_v0 }
  0x75   :  { %1697 = vmatpush3.msra.mxu1 %v2290_v39 }
  0x76   :  { %1698 = vmatprep.subr.mxu1 %v2071_v0 }
  0x77   :  { %1699 = vmatpush3.msra.mxu1 %v2293_v40 }
  0x78   :  { %1700 = vmatprep.subr.mxu1 %v2071_v0 }
  0x79   :  { %1701 = vmatpush3.msra.mxu1 %v2297_v41 }
  0x7a   :  { %1702 = vmatprep.subr.mxu1 %v2071_v0 }
  0x7b   :  { %1703 = vmatpush3.msra.mxu1 %v2301_v42 }
  0x7c   :  { %1704 = vmatprep.subr.mxu1 %v2071_v0 }
  0x7d   :  { %1705 = vmatpush3.msra.mxu1 %v2305_v43 }
  0x7e   :  { %1706 = vmatprep.subr.mxu1 %v2071_v0 }
  0x7f   :  { %1707 = vmatpush3.msra.mxu1 %v2309_v44 }
  0x80   :  { %1708 = vmatprep.subr.mxu1 %v2071_v0 }
  0x81   :  { %1709 = vmatpush3.msra.mxu1 %v2313_v45 }
  0x82   :  { %1760 = vmatprep.subr.mxu1 %v2071_v0 }
 0x10e   :  { %v199_v46 = vpop.f32.mrf.mxu1 }
 0x110   :  { %v1603_v47 = vpop.f32.mrf.mxu1  ;;  %v397_v52 = vpop.f32.mrf.mxu0 }
 0x111   :  { %v438_v8 = vrot.slane %v397_v52, 2 }
 0x112   :  { %v204_v48 = vpop.f32.mrf.mxu1  ;;  %v1665_v54 = vpop.f32.mrf.mxu0 }
 0x114   :  { %v1606_v49 = vpop.f32.mrf.mxu1  ;;  %v402_v56 = vpop.f32.mrf.mxu0 }
 0x115   :  { %v439_v9 = vrot.slane %v402_v56, 2 }
 0x116   :  { %v209_v50 = vpop.f32.mrf.mxu1  ;;  %v1668_v58 = vpop.f32.mrf.mxu0 }
 0x117   :  { %v440_v17 = vsel %vm437_vm3, %v438_v8, %v439_v9 }
 0x118   :  { %v1609_v51 = vpop.f32.mrf.mxu1 }
 0x119   :  { %v407_v60 = vpop.f32.mrf.mxu0 }
 0x11a   :  { %v214_v53 = vpop.f32.mrf.mxu1  ;;  %v441_v14 = vrot.slane %v407_v60, 2 }
 0x11b   :  { %v1671_v62 = vpop.f32.mrf.mxu0 }
 0x11c   :  { %v1612_v55 = vpop.f32.mrf.mxu1  ;;  %v442_v24 = vsel %vm437_vm3, %v439_v9, %v441_v14 }
 0x11d   :  { %v412_v1 = vpop.f32.mrf.mxu0 }
 0x11e   :  { %v219_v57 = vpop.f32.mrf.mxu1  ;;  %v479_v28 = vrot.slane %v412_v1, 2 }
 0x11f   :  { %v1674_v3 = vpop.f32.mrf.mxu0 }
 0x120   :  { %v1615_v59 = vpop.f32.mrf.mxu1  ;;  %v480_v58 = vsel %vm437_vm3, %v441_v14, %v479_v28 }
 0x121   :  { %v417_v7 = vpop.f32.mrf.mxu0 }
 0x122   :  { %v298_v61 = vpop.f32.mrf.mxu1  ;;  %v481_v59 = vrot.slane %v417_v7, 2 }
 0x123   :  { %v425_v4 = vrot.slane %v298_v61, 1  ;;  %v1677_v13 = vpop.f32.mrf.mxu0 }
 0x124   :  { %v1634_v63 = vpop.f32.mrf.mxu1 }
 0x126   :  { %v303_v2 = vpop.f32.mrf.mxu1 }
 0x127   :  { %v426_v5 = vrot.slane %v303_v2, 1 }
 0x128   :  { %v1637_v6 = vpop.f32.mrf.mxu1 }
 0x129   :  { %v427_v10 = vsel %vm424_vm2, %v425_v4, %v426_v5  ;;  %v482_v4 = vsel %vm437_vm3, %v479_v28, %v481_v59 }
 0x12a   :  { %v432_v11 = vadd.f32 %v427_v10, %v199_v46  ;;  %v308_v12 = vpop.f32.mrf.mxu1 }
 0x12b   :  { %v428_v15 = vrot.slane %v308_v12, 1 }
 0x12c   :  { %v1640_v16 = vpop.f32.mrf.mxu1  ;;  %v2322_v20 = vadd.f32 %v440_v17, %v432_v11 }
 0x12d   :  { %v429_v18 = vsel %vm424_vm2, %v426_v5, %v428_v15 }
 0x12e   :  { %v433_v21 = vadd.f32 %v429_v18, %v204_v48  ;;  %v313_v22 = vpop.f32.mrf.mxu1  ;;  %v455_v49 = vmul.f32 %v2322_v20, %v2322_v20 }
 0x12f   :  { %v467_v25 = vrot.slane %v313_v22, 1 }
 0x130   :  { %v2325_v27 = vadd.f32 %v442_v24, %v433_v21  ;;  %v1643_v46 = vpop.f32.mrf.mxu1 }
 0x131   :  { %v468_v47 = vsel %vm424_vm2, %v428_v15, %v467_v25 }
 0x132   :  { %v456_v51 = vmul.f32 %v2325_v27, %v2325_v27  ;;  %v474_v52 = vadd.f32 %v468_v47, %v209_v50  ;;  %v318_v54 = vpop.f32.mrf.mxu1  ;;  %v447_v48 = vadd.f32 %v2325_v27, %v2322_v20 }
 0x133   :  { %v469_v55 = vrot.slane %v318_v54, 1 }
 0x134   :  { %v457_v56 = vadd.f32 %v456_v51, %v455_v49  ;;  %v1646_v60 = vpop.f32.mrf.mxu1  ;;  %v2335_v61 = vadd.f32 %v480_v58, %v474_v52  ;;  %v448_v3 = vrot.slane %v447_v48, 4 }
 0x135   :  { %v470_v62 = vsel %vm424_vm2, %v467_v25, %v469_v55  ;;  %v476_v63 = vadd.f32 %v469_v55, %v219_v57 }
 0x136   :  { %v475_v1 = vadd.f32 %v470_v62, %v214_v53  ;;  %v458_v50 = vrot.slane %v457_v56, 4  ;;  %v507_v5 = vmul.f32 %v2335_v61, %v2335_v61  ;;  %v492_v9 = vrot.slane %v2335_v61, 2 }
 0x137   :  { %v2338_v2 = vadd.f32 %v481_v59, %v476_v63  ;;  %v449_v11 = vadd.f32 %v448_v3, %v447_v48 }
 0x138   :  { %v2343_v6 = vadd.f32 %v482_v4, %v475_v1  ;;  %v459_v12 = vadd.f32 %v458_v50, %v457_v56  ;;  %v513_v13 = vrot.slane %v507_v5, 2 }
 0x139   :  { %v495_v7 = vrot.slane %v2338_v2, 2  ;;  %v509_v8 = vmul.f32 %v2338_v2, %v2338_v2  ;;  %v450_v25 = vrot.slane %v449_v11, 2 }
 0x13a   :  { %v493_v53 = vrot.slane %v2343_v6, 2  ;;  %v508_v57 = vmul.f32 %v2343_v6, %v2343_v6  ;;  %v460_v28 = vrot.slane %v459_v12, 2 }
 0x13b   :  { %v516_v10 = vrot.slane %v509_v8, 2  ;;  %v451_v49 = vadd.f32 %v450_v25, %v449_v11  ;;  %v714_v8 = vld [vmem:[#allocation7 + $0x78] sm:$0xff]  ;;  %v819_v11 = vld [vmem:[#allocation7 + $0xe8] sm:$0xff] }
 0x13c   :  { %v494_v14 = vsel %vm437_vm3, %v492_v9, %v493_v53  ;;  %v496_v15 = vsel %vm437_vm3, %v493_v53, %v495_v7  ;;  %v514_v16 = vrot.slane %v508_v57, 2  ;;  %v461_v51 = vadd.f32 %v460_v28, %v459_v12  ;;  %1714 = vmatpush3.msra.mxu0 %v714_v8  ;;  %v821_v9 = vld [vmem:[#allocation7 + $0xf8] sm:$0xff]  ;;  %v713_v53 = vld [vmem:[#allocation7 + $0x70] sm:$0xff]  ;;  %v711_v12 = vld [vmem:[#allocation7 + $0x60] sm:$0xff] }
 0x13d   :  { %v499_v17 = vadd.f32 %v496_v15, %v494_v14  ;;  %v452_v56 = vrot.slane %v451_v49, 1  ;;  %1715 = vmatprep.subr.mxu0 %v2071_v0  ;;  %v820_v57 = vld [vmem:[#allocation7 + $0xf0] sm:$0xff]  ;;  %v710_v14 = vld [vmem:[#allocation7 + $0x58] sm:$0xff] }
 0x13e   :  { %v515_v18 = vsel %vm437_vm3, %v513_v13, %v514_v16  ;;  %v517_v21 = vsel %vm437_vm3, %v514_v16, %v516_v10  ;;  %v462_v58 = vrot.slane %v461_v51, 1  ;;  %1716 = vmatpush3.msra.mxu0 %v713_v53  ;;  %v712_v10 = vld [vmem:[#allocation7 + $0x68] sm:$0xff]  ;;  %v818_v13 = vld [vmem:[#allocation7 + $0xe0] sm:$0xff]  ;;  %v817_v15 = vld [vmem:[#allocation7 + $0xd8] sm:$0xff] }
 0x13f   :  { %v500_v22 = vrot.slane %v499_v17, 4  ;;  %v520_v24 = vadd.f32 %v517_v21, %v515_v18  ;;  %v453_v1 = vadd.f32 %v452_v56, %v451_v49  ;;  %1717 = vmatprep.subr.mxu0 %v2071_v0  ;;  %v709_v16 = vld [vmem:[#allocation7 + $0x50] sm:$0xff]  ;;  %v708_v18 = vld [vmem:[#allocation7 + $0x48] sm:$0xff]  ;;  %v706_v25 = vld [vmem:[#allocation7 + $0x38] sm:$0xff] }
 0x140   :  { %v463_v3 = vadd.f32 %v462_v58, %v461_v51  ;;  %1718 = vmatpush3.msra.mxu0 %v712_v10  ;;  %v815_v21 = vld [vmem:[#allocation7 + $0xc8] sm:$0xff]  ;;  %v813_v28 = vld [vmem:[#allocation7 + $0xb8] sm:$0xff]  ;;  %v701_v56 = vld [vmem:[#allocation7 + $0x10] sm:$0xff] }
 0x141   :  { %v521_v46 = vrot.slane %v520_v24, 4  ;;  %v501_v47 = vadd.f32 %v500_v22, %v499_v17  ;;  %1719 = vmatprep.subr.mxu0 %v2071_v0  ;;  %v816_v17 = vld [vmem:[#allocation7 + $0xd0] sm:$0xff]  ;;  %v707_v22 = vld [vmem:[#allocation7 + $0x40] sm:$0xff]  ;;  %v704_v49 = vld [vmem:[#allocation7 + $0x28] sm:$0xff] }
 0x142   :  { %1720 = vmatpush3.msra.mxu0 %v711_v12  ;;  %v811_v51 = vld [vmem:[#allocation7 + $0xa8] sm:$0xff]  ;;  %v808_v58 = vld [vmem:[#allocation7 + $0x90] sm:$0xff] }
 0x143   :  { %v502_v52 = vrot.slane %v501_v47, 2  ;;  %v522_v54 = vadd.f32 %v521_v46, %v520_v24  ;;  %1721 = vmatprep.subr.mxu0 %v2071_v0  ;;  %v814_v24 = vld [vmem:[#allocation7 + $0xc0] sm:$0xff]  ;;  %v705_v46 = vld [vmem:[#allocation7 + $0x30] sm:$0xff] }
 0x144   :  { %1722 = vmatpush3.msra.mxu0 %v710_v14 }
 0x145   :  { %v503_v55 = vadd.f32 %v502_v52, %v501_v47  ;;  %v523_v48 = vrot.slane %v522_v54, 2  ;;  %1723 = vmatprep.subr.mxu0 %v2071_v0  ;;  %v812_v47 = vld [vmem:[#allocation7 + $0xb0] sm:$0xff]  ;;  %v703_v52 = vld [vmem:[#allocation7 + $0x20] sm:$0xff] }
 0x146   :  { %1724 = vmatpush3.msra.mxu0 %v709_v16  ;;  %v624_v16 = vld [vmem:[%s2624_s2] sm:$0x1] }
 0x147   :  { %v504_v59 = vrot.slane %v503_v55, 1  ;;  %v524_v60 = vadd.f32 %v523_v48, %v522_v54  ;;  %1725 = vmatprep.subr.mxu0 %v2071_v0  ;;  %v810_v54 = vld [vmem:[#allocation7 + $0xa0] sm:$0xff]  ;;  %v809_v48 = vld [vmem:[#allocation7 + $0x98] sm:$0xff] }
 0x148   :  { %1726 = vmatpush3.msra.mxu0 %v708_v18 }
 0x149   :  { %v505_v62 = vadd.f32 %v504_v59, %v503_v55  ;;  %v525_v63 = vrot.slane %v524_v60, 1  ;;  %1727 = vmatprep.subr.mxu0 %v2071_v0  ;;  %v702_v55 = vld [vmem:[#allocation7 + $0x18] sm:$0xff]  ;;  %v700_v59 = vld [vmem:[#allocation7 + $0x8] sm:$0xff] }
 0x14a   :  { %1728 = vmatpush3.msra.mxu0 %v707_v22  ;;  %v643_v22 = vld [vmem:[%s2625_s3] sm:$0x1] }
 0x14b   :  { %v526_v50 = vadd.f32 %v525_v63, %v524_v60  ;;  %v506_v4 = vadd.f32 %v505_v62, %v453_v1  ;;  %1729 = vmatprep.subr.mxu0 %v2071_v0  ;;  %v807_v60 = vld [vmem:[#allocation7 + $0x88] sm:$0xff]  ;;  %v699_v62 = vld [vmem:[#allocation7] sm:$0xff] }
 0x14c   :  { %1730 = vmatpush3.msra.mxu0 %v706_v25  ;;  %v806_v63 = vld [vmem:[#allocation7 + $0x80] sm:$0xff] }
 0x14d   :  { %v527_v5 = vadd.f32 %v526_v50, %v463_v3  ;;  %1731 = vmatprep.subr.mxu0 %v2071_v0 }
 0x14e   :  { %1732 = vmatpush3.msra.mxu0 %v705_v46 }
 0x14f   :  { %v529_v7 = vsel %vm528_vm4, %v506_v4, %v527_v5  ;;  %1733 = vmatprep.subr.mxu0 %v2071_v0 }
 0x150   :  { %1711 = vmatmul.mubr.f32.vlgmr.msra.gmra.mxu1 %v529_v7  ;;  %1734 = vmatpush3.msra.mxu0 %v704_v49 }
 0x151   :  { %1792 = vmatprep.mubr.msk.f32.mxu1 %vm2072_vm0, %v2071_v0  ;;  %1761 = vmatpush3.msra.mxu1 %v821_v9  ;;  %v2073_v9 = vmov 1966171168  }
 0x152   :  { %1762 = vmatprep.subr.mxu1 %v2071_v0  ;;  %1735 = vmatprep.subr.mxu0 %v2071_v0  ;;  %v627_v53 = vunpack.c.l.s4 %v2073_v9  ;;  %v924_v9 = vld [vmem:[#allocation7 + $0x158] sm:$0xff] }
 0x153   :  { %1763 = vmatpush3.msra.mxu1 %v820_v57  ;;  %1736 = vmatpush3.msra.mxu0 %v703_v52  ;;  %v629_v57 = vlaneseq }
 0x154   :  { %1764 = vmatprep.subr.mxu1 %v2071_v0  ;;  %1737 = vmatprep.subr.mxu0 %v2071_v0  ;;  %v628_v10 = vunpack.c.0.s8 %v627_v53 }
 0x155   :  { %1765 = vmatpush3.msra.mxu1 %v819_v11  ;;  %1738 = vmatpush3.msra.mxu0 %v702_v55  ;;  %v630_v11 = vshrl.u32 %v629_v57, 7 }
 0x156   :  { %1766 = vmatprep.subr.mxu1 %v2071_v0  ;;  %1739 = vmatprep.subr.mxu0 %v2071_v0 }
 0x157   :  { %1767 = vmatpush3.msra.mxu1 %v818_v13  ;;  %1740 = vmatpush3.msra.mxu0 %v701_v56  ;;  %v2391_v12 = vsub.s32 %v628_v10, %v630_v11  ;;  %v2398_v18 = vsub.s32 0, %v630_v11  ;;  %v923_v10 = vld [vmem:[#allocation7 + $0x150] sm:$0xff]  ;;  %v922_v11 = vld [vmem:[#allocation7 + $0x148] sm:$0xff] }
 0x158   :  { %1768 = vmatprep.subr.mxu1 %v2071_v0  ;;  %1741 = vmatprep.subr.mxu0 %v2071_v0 }
 0x159   :  { %1769 = vmatpush3.msra.mxu1 %v817_v15  ;;  %1742 = vmatpush3.msra.mxu0 %v700_v59 }
 0x15a   :  { %1770 = vmatprep.subr.mxu1 %v2071_v0  ;;  %1743 = vmatprep.subr.mxu0 %v2071_v0 }
 0x15b   :  { %1771 = vmatpush3.msra.mxu1 %v816_v17  ;;  %1744 = vmatpush3.msra.mxu0 %v699_v62  ;;  %v928_v62 = vld [vmem:[#allocation7 + $0x178] sm:$0xff] }
 0x15c   :  { %1772 = vmatprep.subr.mxu1 %v2071_v0  ;;  %1807 = vmatprep.subr.mxu0 %v2071_v0 }
 0x15d   :  { %1773 = vmatpush3.msra.mxu1 %v815_v21 }
 0x15e   :  { %1774 = vmatprep.subr.mxu1 %v2071_v0 }
 0x15f   :  { %1775 = vmatpush3.msra.mxu1 %v814_v24 }
 0x160   :  { %1776 = vmatprep.subr.mxu1 %v2071_v0 }
 0x161   :  { %1777 = vmatpush3.msra.mxu1 %v813_v28 }
 0x162   :  { %1778 = vmatprep.subr.mxu1 %v2071_v0 }
 0x163   :  { %1779 = vmatpush3.msra.mxu1 %v812_v47 }
 0x164   :  { %1780 = vmatprep.subr.mxu1 %v2071_v0 }
 0x165   :  { %1781 = vmatpush3.msra.mxu1 %v811_v51 }
 0x166   :  { %1782 = vmatprep.subr.mxu1 %v2071_v0 }
 0x167   :  { %1783 = vmatpush3.msra.mxu1 %v810_v54 }
 0x168   :  { %1784 = vmatprep.subr.mxu1 %v2071_v0 }
 0x169   :  { %1785 = vmatpush3.msra.mxu1 %v809_v48 }
 0x16a   :  { %1786 = vmatprep.subr.mxu1 %v2071_v0 }
 0x16b   :  { %1787 = vmatpush3.msra.mxu1 %v808_v58 }
 0x16c   :  { %1788 = vmatprep.subr.mxu1 %v2071_v0 }
 0x16d   :  { %1789 = vmatpush3.msra.mxu1 %v807_v60 }
 0x16e   :  { %1790 = vmatprep.subr.mxu1 %v2071_v0 }
 0x16f   :  { %1791 = vmatpush3.msra.mxu1 %v806_v63 }
 0x170   :  { %1854 = vmatprep.subr.mxu1 %v2071_v0 }
 0x210   :  { %v612_v1 = vpop.f32.mrf.mxu1 }
 0x211   :  { %v616_v3 = vmul.f32 0.001953125, %v612_v1 }
 0x212   :  { %v1712_v50 = vpop.f32.mrf.mxu1 }
 0x213   :  { %v617_v4 = vmul.f32 %v616_v3, %v616_v3 }
 0x215   :  { %v619_v5 = vrot.slane %v617_v4, 7 }
 0x217   :  { %v621_v7 = vsub.f32 %v616_v3, %v619_v5 }
 0x219   :  { %v622_v8 = vadd.f32 1e-05, %v621_v7 }
 0x21b   :  { %1931 = vrsqrt.f32 %v622_v8 }
 0x228   :  { %v1932_v13 = vpop.eup %1931 }
 0x229   :  { %v632_v14 = vrot.slane %v1932_v13, %v2391_v12 }
 0x22b   :  { %v633_v15 = vcombine.high %v632_v14, %v632_v14 }
 0x22d   :  { %v640_v17 = vrot.slane %v633_v15, %v2391_v12  ;;  %v921_v15 = vld [vmem:[#allocation7 + $0x140] sm:$0xff] }
 0x22f   :  { %v642_v21 = vmul.f32 %v640_v17, %v624_v16  ;;  %v920_v16 = vld [vmem:[#allocation7 + $0x138] sm:$0xff] }
 0x231   :  { %v644_v24 = vmul.f32 %v642_v21, %v616_v3  ;;  %v650_v25 = vrot.slane %v642_v21, %v2398_v18  ;;  %v926_v3 = vld [vmem:[#allocation7 + $0x168] sm:$0xff]  ;;  %v919_v21 = vld [vmem:[#allocation7 + $0x130] sm:$0xff] }
 0x233   :  { %v645_v28 = vsub.f32 %v643_v22, %v644_v24  ;;  %v652_v47 = vmul.f32 %v650_v25, %v2322_v20  ;;  %v653_v49 = vmul.f32 %v650_v25, %v2325_v27  ;;  %v664_v54 = vmul.f32 %v650_v25, %v2335_v61  ;;  %v927_v27 = vld [vmem:[#allocation7 + $0x170] sm:$0xff]  ;;  %v918_v22 = vld [vmem:[#allocation7 + $0x128] sm:$0xff]  ;;  %v917_v24 = vld [vmem:[#allocation7 + $0x120] sm:$0xff] }
 0x234   :  { %v665_v59 = vmul.f32 %v650_v25, %v2343_v6  ;;  %v666_v1 = vmul.f32 %v650_v25, %v2338_v2  ;;  %v925_v2 = vld [vmem:[#allocation7 + $0x160] sm:$0xff]  ;;  %v916_v25 = vld [vmem:[#allocation7 + $0x118] sm:$0xff] }
 0x235   :  { %v658_v46 = vrot.slane %v645_v28, %v2398_v18  ;;  %v915_v28 = vld [vmem:[#allocation7 + $0x110] sm:$0xff] }
 0x237   :  { %v660_v51 = vadd.f32 %v658_v46, %v652_v47  ;;  %v661_v52 = vadd.f32 %v658_v46, %v653_v49  ;;  %v667_v58 = vadd.f32 %v664_v54, %v658_v46  ;;  %v668_v63 = vadd.f32 %v665_v59, %v658_v46 }
 0x238   :  { %v669_v5 = vadd.f32 %v666_v1, %v658_v46 }
 0x239   :  { %v662_v55 = vmax.f32 %v660_v51, 0.0  ;;  %v663_v48 = vmax.f32 %v661_v52, 0.0  ;;  %v670_v61 = vmax.f32 %v667_v58, 0.0  ;;  %v671_v4 = vmax.f32 %v668_v63, 0.0 }
 0x23a   :  { %v672_v57 = vmax.f32 %v669_v5, 0.0 }
 0x23b   :  { %v2414_v60 = vrot.slane %v662_v55, 7  ;;  %v676_v20 = vrot.slane %v663_v48, 7  ;;  %v684_v8 = vrot.slane %v670_v61, 7  ;;  %v685_v53 = vrot.slane %v671_v4, 7 }
 0x23c   :  { %v687_v14 = vrot.slane %v672_v57, 7 }
 0x23d   :  { %1746 = vmatmul.mubr.msk.f32.vlgmr.msra.gmra.mxu0 %vm2409_vm5, %v2414_v60  ;;  %1793 = vmatmul.mubr.msk.f32.vlgmr.msra.gmra.mxu1 %vm2409_vm5, %v2414_v60  ;;  %v693_v6 = vsel %vm528_vm4, %v676_v20, 0.0  ;;  %v2431_v50 = vsel %vm528_vm4, %v2414_v60, %v676_v20  ;;  %v2454_v13 = vsel %vm528_vm4, %v684_v8, %v685_v53 }
 0x23e   :  { %1808 = vmatpush3.msra.mxu0 %v928_v62  ;;  %1748 = vmatprep.mubr.msk.f32.mxu0 %vm2072_vm0, %v2071_v0  ;;  %v695_v7 = vsel %vm694_vm6, %v693_v6, 0.0  ;;  %v2465_v17 = vsel %vm528_vm4, %v685_v53, %v687_v14 }
 0x23f   :  { %1809 = vmatprep.subr.mxu0 %v2071_v0  ;;  %1795 = vmatprep.mubr.msk.f32.mxu1 %vm2072_vm0, %v2071_v0 }
 0x240   :  { %1810 = vmatpush3.msra.mxu0 %v927_v27  ;;  %1855 = vmatpush3.msra.mxu1 %v2255_v30  ;;  %v2443_v30 = vsel %vm696_vm7, %v695_v7, %v684_v8 }
 0x241   :  { %1811 = vmatprep.subr.mxu0 %v2071_v0  ;;  %1749 = vmatmul.mubr.f32.gmra.mxu0 %v2431_v50 }
 0x242   :  { %1796 = vmatmul.mubr.f32.gmra.mxu1 %v2431_v50  ;;  %1812 = vmatpush3.msra.mxu0 %v926_v3 }
 0x243   :  { %1813 = vmatprep.subr.mxu0 %v2071_v0  ;;  %1751 = vmatprep.mubr.msk.f32.mxu0 %vm2072_vm0, %v2071_v0 }
 0x244   :  { %1814 = vmatpush3.msra.mxu0 %v925_v2  ;;  %1798 = vmatprep.mubr.msk.f32.mxu1 %vm2072_vm0, %v2071_v0 }
 0x245   :  { %1815 = vmatprep.subr.mxu0 %v2071_v0  ;;  %1752 = vmatmul.mubr.f32.gmra.mxu0 %v2443_v30 }
 0x246   :  { %1799 = vmatmul.mubr.f32.gmra.mxu1 %v2443_v30  ;;  %1816 = vmatpush3.msra.mxu0 %v924_v9 }
 0x247   :  { %1817 = vmatprep.subr.mxu0 %v2071_v0  ;;  %1754 = vmatprep.mubr.msk.f32.mxu0 %vm2072_vm0, %v2071_v0 }
 0x248   :  { %1818 = vmatpush3.msra.mxu0 %v923_v10  ;;  %1801 = vmatprep.mubr.msk.f32.mxu1 %vm2072_vm0, %v2071_v0 }
 0x249   :  { %1819 = vmatprep.subr.mxu0 %v2071_v0  ;;  %1755 = vmatmul.mubr.f32.gmra.mxu0 %v2454_v13 }
 0x24a   :  { %1802 = vmatmul.mubr.f32.gmra.mxu1 %v2454_v13  ;;  %1820 = vmatpush3.msra.mxu0 %v922_v11 }
 0x24b   :  { %1821 = vmatprep.subr.mxu0 %v2071_v0  ;;  %1757 = vmatprep.mubr.msk.f32.mxu0 %vm2072_vm0, %v2071_v0 }
 0x24c   :  { %1822 = vmatpush3.msra.mxu0 %v921_v15  ;;  %1804 = vmatprep.mubr.msk.f32.mxu1 %vm2072_vm0, %v2071_v0 }
 0x24d   :  { %1823 = vmatprep.subr.mxu0 %v2071_v0  ;;  %1758 = vmatmul.mubr.msk.f32.gmra.mxu0 %vm696_vm7, %v2465_v17 }
 0x24e   :  { %1805 = vmatmul.mubr.msk.f32.gmra.mxu1 %vm696_vm7, %v2465_v17  ;;  %1824 = vmatpush3.msra.mxu0 %v920_v16 }
 0x24f   :  { %1825 = vmatprep.subr.mxu0 %v2071_v0  ;;  %1839 = vmatprep.mubr.msk.f32.mxu0 %vm2072_vm0, %v2071_v0 }
 0x250   :  { %1826 = vmatpush3.msra.mxu0 %v919_v21  ;;  %1856 = vmatprep.subr.mxu1 %v2071_v0 }
 0x251   :  { %1827 = vmatprep.subr.mxu0 %v2071_v0  ;;  %1857 = vmatpush3.msra.mxu1 %v2259_v31  ;;  %v914_v31 = vld [vmem:[#allocation7 + $0x108] sm:$0xff] }
 0x252   :  { %1828 = vmatpush3.msra.mxu0 %v918_v22  ;;  %1858 = vmatprep.subr.mxu1 %v2071_v0 }
 0x253   :  { %1829 = vmatprep.subr.mxu0 %v2071_v0  ;;  %1859 = vmatpush3.msra.mxu1 %v2263_v32  ;;  %v913_v32 = vld [vmem:[#allocation7 + $0x100] sm:$0xff] }
 0x254   :  { %1830 = vmatpush3.msra.mxu0 %v917_v24  ;;  %1860 = vmatprep.subr.mxu1 %v2071_v0 }
 0x255   :  { %1831 = vmatprep.subr.mxu0 %v2071_v0  ;;  %1861 = vmatpush3.msra.mxu1 %v2267_v33  ;;  %v1232_v33 = vld [vmem:[#allocation10 + $0x38] sm:$0xff] }
 0x256   :  { %1832 = vmatpush3.msra.mxu0 %v916_v25  ;;  %1862 = vmatprep.subr.mxu1 %v2071_v0 }
 0x257   :  { %1833 = vmatprep.subr.mxu0 %v2071_v0  ;;  %1863 = vmatpush3.msra.mxu1 %v2271_v34  ;;  %v1231_v34 = vld [vmem:[#allocation10 + $0x30] sm:$0xff] }
 0x258   :  { %1834 = vmatpush3.msra.mxu0 %v915_v28  ;;  %1864 = vmatprep.subr.mxu1 %v2071_v0 }
 0x259   :  { %1835 = vmatprep.subr.mxu0 %v2071_v0  ;;  %1865 = vmatpush3.msra.mxu1 %v2275_v35  ;;  %v1230_v35 = vld [vmem:[#allocation10 + $0x28] sm:$0xff] }
 0x25a   :  { %1836 = vmatpush3.msra.mxu0 %v914_v31  ;;  %1866 = vmatprep.subr.mxu1 %v2071_v0 }
 0x25b   :  { %1837 = vmatprep.subr.mxu0 %v2071_v0  ;;  %1867 = vmatpush3.msra.mxu1 %v2279_v36  ;;  %v1229_v36 = vld [vmem:[#allocation10 + $0x20] sm:$0xff] }
 0x25c   :  { %1838 = vmatpush3.msra.mxu0 %v913_v32  ;;  %1868 = vmatprep.subr.mxu1 %v2071_v0 }
 0x25d   :  { %1840 = vmatmul.mubr.msk.f32.vlgmr.msra.gmra.mxu0 %vm2409_vm5, %v2414_v60  ;;  %1869 = vmatpush3.msra.mxu1 %v2283_v37  ;;  %v1228_v37 = vld [vmem:[#allocation10 + $0x18] sm:$0xff] }
 0x25e   :  { %1842 = vmatprep.mubr.msk.f32.mxu0 %vm2072_vm0, %v2071_v0  ;;  %1870 = vmatprep.subr.mxu1 %v2071_v0 }
 0x25f   :  { %1871 = vmatpush3.msra.mxu1 %v2287_v38  ;;  %1886 = vmatprep.mubr.msk.f32.mxu1 %vm2072_vm0, %v2071_v0  ;;  %v1227_v38 = vld [vmem:[#allocation10 + $0x10] sm:$0xff] }
 0x260   :  { %1872 = vmatprep.subr.mxu1 %v2071_v0  ;;  %1889 = vmatprep.subr.mxu0 %v2071_v0 }
 0x261   :  { %1843 = vmatmul.mubr.f32.gmra.mxu0 %v2431_v50  ;;  %1873 = vmatpush3.msra.mxu1 %v2290_v39  ;;  %v1226_v39 = vld [vmem:[#allocation10 + $0x8] sm:$0xff] }
 0x262   :  { %1845 = vmatprep.mubr.msk.f32.mxu0 %vm2072_vm0, %v2071_v0  ;;  %1874 = vmatprep.subr.mxu1 %v2071_v0 }
 0x263   :  { %1875 = vmatpush3.msra.mxu1 %v2293_v40  ;;  %1890 = vmatpush3.msra.mxu0 %v1232_v33  ;;  %v1225_v40 = vld [vmem:[#allocation10] sm:$0xff] }
 0x264   :  { %1876 = vmatprep.subr.mxu1 %v2071_v0  ;;  %1891 = vmatprep.subr.mxu0 %v2071_v0 }
 0x265   :  { %1846 = vmatmul.mubr.f32.gmra.mxu0 %v2443_v30  ;;  %1877 = vmatpush3.msra.mxu1 %v2297_v41  ;;  %v1935_v41 = vld [vmem:[#allocation2] sm:$0xff] }
 0x266   :  { %1848 = vmatprep.mubr.msk.f32.mxu0 %vm2072_vm0, %v2071_v0  ;;  %1878 = vmatprep.subr.mxu1 %v2071_v0 }
 0x267   :  { %1879 = vmatpush3.msra.mxu1 %v2301_v42  ;;  %1892 = vmatpush3.msra.mxu0 %v1231_v34 }
 0x268   :  { %1880 = vmatprep.subr.mxu1 %v2071_v0  ;;  %1893 = vmatprep.subr.mxu0 %v2071_v0 }
 0x269   :  { %1849 = vmatmul.mubr.f32.gmra.mxu0 %v2454_v13  ;;  %1881 = vmatpush3.msra.mxu1 %v2305_v43 }
 0x26a   :  { %1851 = vmatprep.mubr.msk.f32.mxu0 %vm2072_vm0, %v2071_v0  ;;  %1882 = vmatprep.subr.mxu1 %v2071_v0 }
 0x26b   :  { %1883 = vmatpush3.msra.mxu1 %v2309_v44  ;;  %1894 = vmatpush3.msra.mxu0 %v1230_v35 }
 0x26c   :  { %1884 = vmatprep.subr.mxu1 %v2071_v0  ;;  %1895 = vmatprep.subr.mxu0 %v2071_v0 }
 0x26d   :  { %1852 = vmatmul.mubr.msk.f32.gmra.mxu0 %vm696_vm7, %v2465_v17  ;;  %1885 = vmatpush3.msra.mxu1 %v2313_v45 }
 0x26e   :  { %1905 = vmatprep.mubr.msk.f32.mxu0 %vm2072_vm0, %v2071_v0  ;;  %1896 = vmatpush3.msra.mxu0 %v1229_v36 }
 0x26f   :  { %1897 = vmatprep.subr.mxu0 %v2071_v0 }
 0x270   :  { %1898 = vmatpush3.msra.mxu0 %v1228_v37 }
 0x271   :  { %1899 = vmatprep.subr.mxu0 %v2071_v0 }
 0x272   :  { %1900 = vmatpush3.msra.mxu0 %v1227_v38 }
 0x273   :  { %1901 = vmatprep.subr.mxu0 %v2071_v0 }
 0x274   :  { %1902 = vmatpush3.msra.mxu0 %v1226_v39 }
 0x275   :  { %1903 = vmatprep.subr.mxu0 %v2071_v0 }
 0x276   :  { %1904 = vmatpush3.msra.mxu0 %v1225_v40 }
 0x277   :  { %1906 = vmatmul.mubr.msk.f32.vlgmr.msra.gmra.mxu0 %vm117_vm1, %v1935_v41 }
 0x278   :  { %1908 = vmatprep.mubr.msk.f32.mxu0 %vm2072_vm0, %v2071_v0 }
 0x27b   :  { %1909 = vmatmul.mubr.msk.f32.gmra.mxu0 %vm117_vm1, %v2182_v19 }
 0x27c   :  { %1911 = vmatprep.mubr.msk.f32.mxu0 %vm2072_vm0, %v2071_v0 }
 0x27f   :  { %1912 = vmatmul.mubr.msk.f32.gmra.mxu0 %vm117_vm1, %v2191_v23 }
 0x280   :  { %1914 = vmatprep.mubr.msk.f32.mxu0 %vm2072_vm0, %v2071_v0 }
 0x283   :  { %1915 = vmatmul.mubr.msk.f32.gmra.mxu0 %vm117_vm1, %v2200_v26 }
 0x284   :  { %1917 = vmatprep.mubr.msk.f32.mxu0 %vm2072_vm0, %v2071_v0 }
 0x287   :  { %1918 = vmatmul.mubr.msk.f32.gmra.mxu0 %vm117_vm1, %v2211_v29 }
 0x2fd   :  { %v781_v42 = vpop.f32.mrf.mxu0  ;;  %v888_v19 = vpop.f32.mrf.mxu1 }
 0x2fe   :  { %v1022_v63 = vrot.slane %v888_v19, 1 }
 0x2ff   :  { %v1747_v43 = vpop.f32.mrf.mxu0  ;;  %v1794_v44 = vpop.f32.mrf.mxu1 }
 0x301   :  { %v786_v45 = vpop.f32.mrf.mxu0 }
 0x302   :  { %v893_v46 = vpop.f32.mrf.mxu1 }
 0x303   :  { %v1750_v47 = vpop.f32.mrf.mxu0  ;;  %v1023_v62 = vrot.slane %v893_v46, 1 }
 0x304   :  { %v1797_v23 = vpop.f32.mrf.mxu1 }
 0x305   :  { %v791_v49 = vpop.f32.mrf.mxu0  ;;  %v1024_v6 = vsel %vm424_vm2, %v1022_v63, %v1023_v62 }
 0x306   :  { %v898_v51 = vpop.f32.mrf.mxu1  ;;  %v1029_v7 = vadd.f32 %v1024_v6, %v781_v42 }
 0x307   :  { %v1753_v52 = vpop.f32.mrf.mxu0  ;;  %v1025_v27 = vrot.slane %v898_v51, 1 }
 0x308   :  { %v1800_v54 = vpop.f32.mrf.mxu1 }
 0x309   :  { %v796_v55 = vpop.f32.mrf.mxu0  ;;  %v1026_v4 = vsel %vm424_vm2, %v1023_v62, %v1025_v27 }
 0x30a   :  { %v903_v26 = vpop.f32.mrf.mxu1  ;;  %v1030_v30 = vadd.f32 %v1026_v4, %v786_v45 }
 0x30b   :  { %v1756_v48 = vpop.f32.mrf.mxu0  ;;  %v1063_v5 = vrot.slane %v903_v26, 1 }
 0x30c   :  { %v1803_v56 = vpop.f32.mrf.mxu1 }
 0x30d   :  { %v801_v0 = vpop.f32.mrf.mxu0  ;;  %v1064_v10 = vsel %vm424_vm2, %v1025_v27, %v1063_v5 }
 0x30e   :  { %v908_v58 = vpop.f32.mrf.mxu1  ;;  %v1070_v17 = vadd.f32 %v1064_v10, %v791_v49 }
 0x30f   :  { %v1759_v59 = vpop.f32.mrf.mxu0  ;;  %v1065_v11 = vrot.slane %v908_v58, 1 }
 0x310   :  { %v1806_v29 = vpop.f32.mrf.mxu1 }
 0x311   :  { %v1066_v25 = vsel %vm424_vm2, %v1063_v5, %v1065_v11  ;;  %v1072_v35 = vadd.f32 %v1065_v11, %v801_v0 }
 0x312   :  { %v1071_v37 = vadd.f32 %v1066_v25, %v796_v55 }
 0x31d   :  { %v995_v60 = vpop.f32.mrf.mxu0 }
 0x31e   :  { %v1034_v1 = vrot.slane %v995_v60, 2 }
 0x31f   :  { %v1841_v20 = vpop.f32.mrf.mxu0 }
 0x321   :  { %v1000_v61 = vpop.f32.mrf.mxu0 }
 0x322   :  { %v1035_v3 = vrot.slane %v1000_v61, 2 }
 0x323   :  { %v1844_v50 = vpop.f32.mrf.mxu0 }
 0x324   :  { %v1036_v2 = vsel %vm437_vm3, %v1034_v1, %v1035_v3 }
 0x325   :  { %v1005_v8 = vpop.f32.mrf.mxu0  ;;  %v2559_v53 = vadd.f32 %v1036_v2, %v1029_v7 }
 0x326   :  { %v1037_v9 = vrot.slane %v1005_v8, 2 }
 0x327   :  { %v1847_v57 = vpop.f32.mrf.mxu0  ;;  %v1051_v21 = vmul.f32 %v2559_v53, %v2559_v53 }
 0x328   :  { %v1038_v13 = vsel %vm437_vm3, %v1035_v3, %v1037_v9 }
 0x329   :  { %v2563_v14 = vadd.f32 %v1038_v13, %v1030_v30  ;;  %v1010_v15 = vpop.f32.mrf.mxu0 }
 0x32a   :  { %v1075_v16 = vrot.slane %v1010_v15, 2 }
 0x32b   :  { %v1052_v22 = vmul.f32 %v2563_v14, %v2563_v14  ;;  %v1850_v24 = vpop.f32.mrf.mxu0  ;;  %v1043_v28 = vadd.f32 %v2563_v14, %v2559_v53 }
 0x32c   :  { %v1076_v31 = vsel %vm437_vm3, %v1037_v9, %v1075_v16 }
 0x32d   :  { %v1053_v32 = vadd.f32 %v1052_v22, %v1051_v21  ;;  %v2573_v33 = vadd.f32 %v1076_v31, %v1070_v17  ;;  %v1015_v34 = vpop.f32.mrf.mxu0  ;;  %v1044_v39 = vrot.slane %v1043_v28, 4  ;;  %v1430_v21 = vld [vmem:[%s2631_s9] ss:$0 sm:$0xff] }
 0x32e   :  { %v1077_v36 = vrot.slane %v1015_v34, 2 }
 0x32f   :  { %v1853_v38 = vpop.f32.mrf.mxu0  ;;  %v1054_v40 = vrot.slane %v1053_v32, 4  ;;  %v1103_v19 = vmul.f32 %v2573_v33, %v2573_v33  ;;  %v1088_v46 = vrot.slane %v2573_v33, 2  ;;  %v1045_v49 = vadd.f32 %v1044_v39, %v1043_v28 }
 0x330   :  { %v1078_v41 = vsel %vm437_vm3, %v1075_v16, %v1077_v36  ;;  %v2576_v42 = vadd.f32 %v1077_v36, %v1072_v35 }
 0x331   :  { %v2580_v43 = vadd.f32 %v1078_v41, %v1071_v37  ;;  %v1055_v51 = vadd.f32 %v1054_v40, %v1053_v32  ;;  %v1109_v54 = vrot.slane %v1103_v19, 2  ;;  %v1046_v59 = vrot.slane %v1045_v49, 2 }
 0x332   :  { %v1091_v44 = vrot.slane %v2576_v42, 2  ;;  %v1105_v45 = vmul.f32 %v2576_v42, %v2576_v42 }
 0x333   :  { %v1089_v47 = vrot.slane %v2580_v43, 2  ;;  %v1104_v23 = vmul.f32 %v2580_v43, %v2580_v43  ;;  %v1056_v62 = vrot.slane %v1055_v51, 2  ;;  %v1047_v61 = vadd.f32 %v1046_v59, %v1045_v49 }
 0x334   :  { %v1112_v52 = vrot.slane %v1105_v45, 2 }
 0x335   :  { %v1090_v55 = vsel %vm437_vm3, %v1088_v46, %v1089_v47  ;;  %v1092_v26 = vsel %vm437_vm3, %v1089_v47, %v1091_v44  ;;  %v1110_v48 = vrot.slane %v1104_v23, 2  ;;  %v1057_v6 = vadd.f32 %v1056_v62, %v1055_v51 }
 0x336   :  { %v1095_v56 = vadd.f32 %v1092_v26, %v1090_v55  ;;  %v1048_v4 = vrot.slane %v1047_v61, 1 }
 0x337   :  { %v1111_v0 = vsel %vm437_vm3, %v1109_v54, %v1110_v48  ;;  %v1113_v58 = vsel %vm437_vm3, %v1110_v48, %v1112_v52  ;;  %v1058_v5 = vrot.slane %v1057_v6, 1  ;;  %v1306_v16 = vpop.f32.mrf.mxu0 }
 0x338   :  { %v1096_v29 = vrot.slane %v1095_v56, 4  ;;  %v1116_v60 = vadd.f32 %v1113_v58, %v1111_v0  ;;  %v1049_v30 = vadd.f32 %v1048_v4, %v1047_v61  ;;  %v1307_v24 = vadd.f32 %v1430_v21, %v1306_v16 }
 0x339   :  { %v1059_v57 = vadd.f32 %v1058_v5, %v1057_v6  ;;  %v1907_v17 = vpop.f32.mrf.mxu0 }
 0x33a   :  { %v1097_v20 = vadd.f32 %v1096_v29, %v1095_v56  ;;  %v1117_v63 = vrot.slane %v1116_v60, 4  ;;  %v1349_v31 = vrot.slane %v1307_v24, 1 }
 0x33b   :  { %v1311_v22 = vpop.f32.mrf.mxu0 }
 0x33c   :  { %v1118_v27 = vadd.f32 %v1117_v63, %v1116_v60  ;;  %v1098_v1 = vrot.slane %v1097_v20, 2  ;;  %v1312_v25 = vadd.f32 %v1430_v21, %v1311_v22  ;;  %v1203_v60 = vld [vmem:[%s2627_s5] sm:$0x1]  ;;  %s2074_s5 = smov [#allocation11]  }
 0x33d   :  { %v1910_v28 = vpop.f32.mrf.mxu0  ;;  %v1222_v63 = vld [vmem:[%s2628_s6] sm:$0x1]  ;;  %s1392_s6 = sshll.u32 %s2074_s5, 4  ;;  %s1393_s6 = int_to_ptr.vmem [resolvable:$true] %s1392_s6 }
 0x33e   :  { %v1099_v3 = vadd.f32 %v1098_v1, %v1097_v20  ;;  %v1119_v50 = vrot.slane %v1118_v27, 2  ;;  %v1350_v32 = vrot.slane %v1312_v25, 1  ;;  %s2036_s24 = scalar_lea.vmem %s1393_s6, 512  ;;  %p2041_p12 = scmp.lt.s32.totalorder %s1393_s6, %s1393_s6 }
 0x33f   :  { %v1316_v34 = vpop.f32.mrf.mxu0  ;;  %p2037_p11 = scmp.ne.s32.totalorder %s1393_s6, %s2036_s24  ;;  %p2042_p13 = scmp.lt.s32.totalorder %s2036_s24, %s2036_s24 }
 0x340   :  { %v1100_v2 = vrot.slane %v1099_v3, 1  ;;  %v1120_v7 = vadd.f32 %v1119_v50, %v1118_v27  ;;  %v1351_v35 = vsel %vm424_vm2, %v1349_v31, %v1350_v32  ;;  %v1317_v36 = vadd.f32 %v1430_v21, %v1316_v34 }
 0x341   :  { %v1913_v37 = vpop.f32.mrf.mxu0  ;;  %p2043_p0 = por %p2042_p13, %p2041_p12 }
 0x342   :  { %v1101_v8 = vadd.f32 %v1100_v2, %v1099_v3  ;;  %v1121_v9 = vrot.slane %v1120_v7, 1  ;;  %v1352_v38 = vrot.slane %v1317_v36, 1 }
 0x343   :  { %v1321_v39 = vpop.f32.mrf.mxu0  ;;  %p2044_p1 = pnand %p2043_p0, %p2037_p11 }
 0x344   :  { %v1122_v10 = vadd.f32 %v1121_v9, %v1120_v7  ;;  %v1102_v11 = vadd.f32 %v1101_v8, %v1049_v30  ;;  %v1353_v40 = vsel %vm424_vm2, %v1350_v32, %v1352_v38  ;;  %v1322_v41 = vadd.f32 %v1430_v21, %v1321_v39 }
 0x345   :  { %v1916_v19 = vpop.f32.mrf.mxu0 }
 0x346   :  { %v1123_v13 = vadd.f32 %v1122_v10, %v1059_v57  ;;  %v1370_v44 = vrot.slane %v1322_v41, 1 }
 0x347   :  { %v1326_v45 = vpop.f32.mrf.mxu0 }
 0x348   :  { %v1124_v15 = vsel %vm528_vm4, %v1102_v11, %v1123_v13  ;;  %v1371_v46 = vsel %vm424_vm2, %v1352_v38, %v1370_v44  ;;  %v1327_v47 = vadd.f32 %v1430_v21, %v1326_v45 }
 0x349   :  { %1887 = vmatmul.mubr.f32.vlgmr.msra.gmra.mxu1 %v1124_v15  ;;  %v1919_v23 = vpop.f32.mrf.mxu0 }
 0x34a   :  { %v1372_v49 = vrot.slane %v1327_v47, 1 }
 0x34c   :  { %v1373_v51 = vsel %vm424_vm2, %v1370_v44, %v1372_v49 }
 0x409   :  { %v1191_v52 = vpop.f32.mrf.mxu1 }
 0x40a   :  { %v1195_v54 = vmul.f32 0.001953125, %v1191_v52 }
 0x40b   :  { %v1888_v55 = vpop.f32.mrf.mxu1 }
 0x40c   :  { %v1196_v26 = vmul.f32 %v1195_v54, %v1195_v54 }
 0x40e   :  { %v1198_v48 = vrot.slane %v1196_v26, 7 }
 0x410   :  { %v1200_v56 = vsub.f32 %v1195_v54, %v1198_v48 }
 0x412   :  { %v1201_v0 = vadd.f32 1e-05, %v1200_v56 }
 0x414   :  { %1933 = vrsqrt.f32 %v1201_v0 }
 0x421   :  { %v1934_v58 = vpop.eup %1933 }
 0x422   :  { %v1211_v59 = vrot.slane %v1934_v58, %v2391_v12 }
 0x424   :  { %v1212_v29 = vcombine.high %v1211_v59, %v1211_v59 }
 0x426   :  { %v1219_v62 = vrot.slane %v1212_v29, %v2391_v12 }
 0x428   :  { %v1221_v20 = vmul.f32 %v1219_v62, %v1203_v60 }
 0x42a   :  { %v1223_v27 = vmul.f32 %v1221_v20, %v1195_v54  ;;  %v1334_v61 = vrot.slane %v1221_v20, %v2398_v18 }
 0x42c   :  { %v1224_v6 = vsub.f32 %v1222_v63, %v1223_v27  ;;  %v1336_v1 = vmul.f32 %v1334_v61, %v2559_v53  ;;  %v1337_v50 = vmul.f32 %v1334_v61, %v2563_v14  ;;  %v1362_v4 = vmul.f32 %v1334_v61, %v2573_v33 }
 0x42d   :  { %v1363_v5 = vmul.f32 %v1334_v61, %v2580_v43  ;;  %v1364_v12 = vmul.f32 %v1334_v61, %v2576_v42 }
 0x42e   :  { %v1342_v3 = vrot.slane %v1224_v6, %v2398_v18 }
 0x430   :  { %v1344_v2 = vadd.f32 %v1342_v3, %v1336_v1  ;;  %v1345_v7 = vadd.f32 %v1342_v3, %v1337_v50  ;;  %v1365_v8 = vadd.f32 %v1362_v4, %v1342_v3  ;;  %v1366_v9 = vadd.f32 %v1363_v5, %v1342_v3 }
 0x431   :  { %v1367_v30 = vadd.f32 %v1364_v12, %v1342_v3 }
 0x432   :  { %v1356_v57 = vadd.f32 %v1351_v35, %v1344_v2  ;;  %v1357_v10 = vadd.f32 %v1353_v40, %v1345_v7  ;;  %v1377_v11 = vadd.f32 %v1371_v46, %v1365_v8  ;;  %v1378_v13 = vadd.f32 %v1373_v51, %v1366_v9 }
 0x433   :  { %v1379_v18 = vadd.f32 %v1372_v49, %v1367_v30 }
 0x434   :  { %v1358_v53 = vmax.f32 %v1356_v57, 0.0  ;;  %v1359_v14 = vmax.f32 %v1357_v10, 0.0  ;;  %v1380_v15 = vmax.f32 %v1377_v11, 0.0  ;;  %v1381_v33 = vmax.f32 %v1378_v13, 0.0 }
 0x435   :  { %v1382_v16 = vmax.f32 %v1379_v18, 0.0 }
 0x436   :  { %1360 = vst [vmem:[#allocation11] sm:$0xff] %v1358_v53  ;;  %1361 = vst [vmem:[#allocation11 + $0x8] sm:$0xff] %v1359_v14 }
 0x437   :  { %1384 = vst [vmem:[#allocation11 + $0xe] sm:$0xfc] %v1380_v15  ;;  %1385 = vst [vmem:[#allocation11 + $0x16] sm:$0xff] %v1381_v33 }
 0x438   :  { %1386 = vst [vmem:[#allocation11 + $0x1e] sm:$0x3] %v1382_v16 }
 0x439   :  { %2047 = shalt.err (!%p2044_p1)
}
 0x43a   :  { %1398 = dma.vmem_to_hbm [thread:$0]  %s1393_s6, 512, %s2632_s10, [#allocation4], %s2066_s18, %s2066_s18, %s2067_s19  }
 0x43b   :  { %2062 = dma.done.wait [#allocation4], 512  }
 0x43c   :  { %2063 = vsyncadd [#allocation4], 4294966784 }
 0x43d   :  { %1402 = vsyncpa [#allocation3], 1 }
 0x43e   :  { %1403 = vsyncpa [#allocation6], 1 }
 0x43f   :  { %1404 = vsyncpa [#allocation9], 1 }
 0x440   :  { %1405 = vsyncpa [#allocation4], 1 }

</bundles_post_ra>
